<compile_context>
chip_gen: v7x
topology: tpu7x:2x2x1
jax: 0.10.0
libtpu: 0.0.40
codegen_flags: <defaults>
</compile_context>

<pallas_src>
import functools

import jax
import jax.numpy as jnp
from jax.experimental import pallas as pl
from jax.experimental.pallas import tpu as pltpu

HEAD_PAD = 128  # lane-dense width for the 2-wide / num_class-wide classifier heads


def classifier_kernel(x_ref, pool_ref,
                      w1_ref, b1_ref,
                      wd_ref, bd_ref,
                      wdc_ref, bdc_ref,
                      whv_ref, bhv_ref,
                      wdvc_ref, bdvc_ref,
                      pred_df_ref, pred_vid_ref):
    """Fused forward over one tile of videos (source and target concatenated).

    x_ref        : (TILE_B * S, D) bf16 flattened frame features
    pool_ref     : (TILE_B, TILE_B * S) bf16 block-diagonal 0/1 pooling pattern
    w*/b*        : VMEM-resident weights (bf16) / biases (f32); heads are
                   zero-padded to HEAD_PAD lanes; whv = [w_vid_cls | w_dom_vid];
                   wdvc/bdvc are lane-shifted to columns [num_class:num_class+2].
    pred_df_ref  : (TILE_B * S, HEAD_PAD) bf16 frame domain logits ('GSD', cols 0:2)
    pred_vid_ref : (TILE_B, HEAD_PAD) f32 merged per-video logits:
                   cols [0:num_class] video class, cols [num_class:num_class+2] 'GVD'.
    """
    tile_b = pred_vid_ref.shape[0]
    tile_n = x_ref.shape[0]
    s = tile_n // tile_b
    head_pad = pred_vid_ref.shape[-1]

    x = x_ref[...]                                             # (tile_n, D) bf16

    # fc_feature_shared_source -> ReLU (dropout_i identity in eval; GradReverse
    # identity in forward).
    h = jnp.dot(x, w1_ref[...], preferred_element_type=jnp.float32) + b1_ref[...]
    h = jnp.maximum(h, 0.0)
    h_bf = h.astype(jnp.bfloat16)

    # domain_classifier_frame: Linear -> ReLU -> Linear(D, 2) [128-lane padded].
    df = jnp.dot(h_bf, wd_ref[...], preferred_element_type=jnp.float32) + bd_ref[...]
    df = jnp.maximum(df, 0.0).astype(jnp.bfloat16)
    pred_df = jnp.dot(df, wdc_ref[...], preferred_element_type=jnp.float32) + bdc_ref[...]
    pred_df_ref[...] = pred_df.astype(pred_df_ref.dtype)       # bf16 store

    # aggregate_frames (avgpool): block-diagonal pooling matmul on the MXU
    # (avoids the (tile_n)->(tb,s,d) reshape + strided XLU reduce); the pool
    # matrix holds exact ones in bf16, the 1/s scale is applied in f32.
    hv = jnp.dot(pool_ref[...], h_bf,
                 preferred_element_type=jnp.float32) * (1.0 / s)  # (tile_b, D) f32
    hv_bf = hv.astype(jnp.bfloat16)

    # Fused [fc_classifier_video_source | fc_feature_domain_video] matmul.
    hv_out = jnp.dot(hv_bf, whv_ref[...],
                     preferred_element_type=jnp.float32) + bhv_ref[...]

    # domain_classifier_video: ReLU -> Linear(D, 2); head weights are
    # lane-shifted so the result sums into the same 128-lane row as the
    # video-class logits (disjoint, zero-padded columns).
    dv = jnp.maximum(hv_out[:, head_pad:], 0.0).astype(jnp.bfloat16)
    pred_dv = jnp.dot(dv, wdvc_ref[...],
                      preferred_element_type=jnp.float32) + bdvc_ref[...]

    pred_vid_ref[...] = hv_out[:, :head_pad] + pred_dv


def init_params(key, feature_dim, num_class, std=0.001):
    """Deterministic init matching normal_(w, 0, 0.001) / constant_(b, 0)."""
    ks = jax.random.split(key, 6)

    def lin(k, d_in, d_out):
        # stored pre-transposed as (in, out); bias as (1, out) for broadcast
        w = (jax.random.normal(k, (d_out, d_in), jnp.float32) * std).T
        bias = jnp.zeros((1, d_out), jnp.float32)
        return w, bias

    p = {}
    p["w_shared"], p["b_shared"] = lin(ks[0], feature_dim, feature_dim)      # fc_feature_shared_source
    p["w_dom"], p["b_dom"] = lin(ks[1], feature_dim, feature_dim)            # fc_feature_domain
    p["w_dom_cls"], p["b_dom_cls"] = lin(ks[2], feature_dim, 2)              # fc_classifier_domain
    p["w_vid_cls"], p["b_vid_cls"] = lin(ks[3], feature_dim, num_class)      # fc_classifier_video_source
    p["w_dom_vid"], p["b_dom_vid"] = lin(ks[4], feature_dim, feature_dim)    # fc_feature_domain_video
    p["w_dom_vid_cls"], p["b_dom_vid_cls"] = lin(ks[5], feature_dim, 2)      # fc_classifier_domain_video
    return p


def _pack_params(params, num_class):
    """Pad heads to HEAD_PAD lanes, fuse the two hv consumers, cast to bf16."""
    assert num_class + 2 <= HEAD_PAD, "merged video head needs num_class + 2 <= 128"

    def pad_head(w, b, col_offset=0):
        extra = HEAD_PAD - col_offset - w.shape[1]
        assert extra >= 0, "head width must fit within HEAD_PAD"
        return (jnp.pad(w, ((0, 0), (col_offset, extra))),
                jnp.pad(b, ((0, 0), (col_offset, extra))))

    wdc, bdc = pad_head(params["w_dom_cls"], params["b_dom_cls"])
    wvc, bvc = pad_head(params["w_vid_cls"], params["b_vid_cls"])
    # video-domain head lands in columns [num_class : num_class+2] of the merged row
    wdvc, bdvc = pad_head(params["w_dom_vid_cls"], params["b_dom_vid_cls"],
                          col_offset=num_class)
    whv = jnp.concatenate([wvc, params["w_dom_vid"]], axis=1)    # (D, HEAD_PAD + D)
    bhv = jnp.concatenate([bvc, params["b_dom_vid"]], axis=1)    # (1, HEAD_PAD + D)

    bf16 = lambda a: a.astype(jnp.bfloat16)
    f32 = lambda a: a.astype(jnp.float32)
    return {
        "w1": bf16(params["w_shared"]), "b1": f32(params["b_shared"]),
        "wd": bf16(params["w_dom"]),    "bd": f32(params["b_dom"]),
        "wdc": bf16(wdc),               "bdc": f32(bdc),
        "whv": bf16(whv),               "bhv": f32(bhv),
        "wdvc": bf16(wdvc),             "bdvc": f32(bdvc),
    }


def _round_up(v, m):
    return ((v + m - 1) // m) * m


def _choose_tile_b(b_total, max_tile_b=128):
    """Pick tile_b: multiple of 16 (bf16 sublane packing of tile_b*S rows),
    large enough to feed the MXU, and >= 2 grid steps when the batch allows it
    (so v7x megacore sharding is not a no-op)."""
    max_tile_b = max(16, (max_tile_b // 16) * 16)
    b16 = _round_up(b_total, 16)
    if b16 <= max_tile_b:
        if b16 >= 32:
            return max(16, _round_up(b16 // 2, 16))     # 2 steps for megacore
        return b16
    n_tiles = max(2, pl.cdiv(b16, max_tile_b))
    return min(max_tile_b, _round_up(pl.cdiv(b16, n_tiles), 16))


def _vmem_limit_bytes():
    """Generation-aware VMEM limit: ~96 MiB on v5e/v6e (128 MiB physical),
    ~48 MiB on v7x (64 MiB physical)."""
    try:
        cap = int(pltpu.get_tpu_info().vmem_capacity_bytes)
    except Exception:
        cap = 64 * 1024 * 1024
    return max(32 * 1024 * 1024, min(3 * cap // 4, 100 * 1024 * 1024))


def _run_kernel(x_flat, pool, packed, tile_b, num_segments, single_buffer_weights):
    n_pad, d = x_flat.shape
    s = num_segments
    b_pad = n_pad // s
    tile_n = tile_b * s
    grid = (b_pad // tile_b,)

    # Weights never change block index -> single-buffer them to halve their
    # VMEM residency (critical on v7x's 64 MiB VMEM).
    weight_mode = pl.Buffered(1) if single_buffer_weights else None

    def const_spec(arr):  # weights resident in VMEM across the whole grid
        return pl.BlockSpec(arr.shape, lambda i: (0, 0), pipeline_mode=weight_mode)

    in_specs = [
        # x tile: default double-buffered pipelining (Buffered(3) is a possible
        # further sweep once weights are single-buffered).
        pl.BlockSpec((tile_n, d), lambda i: (i, 0)),
        const_spec(pool),
        const_spec(packed["w1"]), const_spec(packed["b1"]),
        const_spec(packed["wd"]), const_spec(packed["bd"]),
        const_spec(packed["wdc"]), const_spec(packed["bdc"]),
        const_spec(packed["whv"]), const_spec(packed["bhv"]),
        const_spec(packed["wdvc"]), const_spec(packed["bdvc"]),
    ]
    out_specs = (
        pl.BlockSpec((tile_n, HEAD_PAD), lambda i: (i, 0)),    # frame-domain logits
        pl.BlockSpec((tile_b, HEAD_PAD), lambda i: (i, 0)),    # merged per-video logits
    )
    out_shape = (
        jax.ShapeDtypeStruct((n_pad, HEAD_PAD), jnp.bfloat16),
        jax.ShapeDtypeStruct((b_pad, HEAD_PAD), jnp.float32),
    )

    flops = (
        2 * n_pad * d * d                      # shared fc
        + 2 * n_pad * d * d                    # frame-domain hidden
        + 2 * n_pad * d * HEAD_PAD             # frame-domain head
        + 2 * b_pad * tile_n * d               # avgpool as block-diagonal matmul
        + 2 * b_pad * d * (HEAD_PAD + d)       # fused video-cls | video-domain hidden
        + 2 * b_pad * d * HEAD_PAD             # video-domain head
    )
    weight_bytes = sum(int(v.size) * v.dtype.itemsize for v in packed.values())
    bytes_accessed = (
        int(x_flat.size) * 2 + int(pool.size) * 2 + weight_bytes
        + 2 * n_pad * HEAD_PAD                 # bf16 frame-domain output
        + 4 * b_pad * HEAD_PAD                 # f32 merged per-video output
    )

    return pl.pallas_call(
        classifier_kernel,
        out_shape=out_shape,
        grid_spec=pltpu.PrefetchScalarGridSpec(
            num_scalar_prefetch=0,
            grid=grid,
            in_specs=in_specs,
            out_specs=out_specs,
        ),
        compiler_params=pltpu.CompilerParams(
            dimension_semantics=("parallel",),     # shards across v7x's 2 TCs
            vmem_limit_bytes=_vmem_limit_bytes(),
        ),
        cost_estimate=pl.CostEstimate(
            flops=flops, transcendentals=0, bytes_accessed=bytes_accessed),
    )(
        x_flat, pool,
        packed["w1"], packed["b1"],
        packed["wd"], packed["bd"],
        packed["wdc"], packed["bdc"],
        packed["whv"], packed["bhv"],
        packed["wdvc"], packed["bdvc"],
    )


def classifier_forward(params, input_source, input_target, num_segments, num_class,
                       max_tile_b=128, single_buffer_weights=True):
    """Mirrors Classifier.forward (share_params='Y', add_fc=1, avgpool, eval)."""
    bs = input_source.shape[0]
    bt = input_target.shape[0]
    d = input_source.shape[-1]
    s = num_segments
    b_total = bs + bt

    tile_b = _choose_tile_b(b_total, max_tile_b)
    b_pad = _round_up(b_total, tile_b)
    tile_n = tile_b * s

    # One fused kernel for both domains (shared params) -> weights read once.
    # Single concatenate of bf16-cast pieces (+ zero tail) -> one HBM copy of x.
    pieces = [input_source.reshape(bs * s, d).astype(jnp.bfloat16),
              input_target.reshape(bt * s, d).astype(jnp.bfloat16)]
    if b_pad != b_total:
        pieces.append(jnp.zeros(((b_pad - b_total) * s, d), jnp.bfloat16))
    x = jnp.concatenate(pieces, axis=0)

    # Block-diagonal 0/1 pooling pattern, identical for every tile.
    frame_vid = jnp.arange(tile_n, dtype=jnp.int32) // s
    pool = (frame_vid[None, :] == jnp.arange(tile_b, dtype=jnp.int32)[:, None]
            ).astype(jnp.bfloat16)

    packed = _pack_params(params, num_class)
    pred_df_pad, pred_vid_pad = _run_kernel(
        x, pool, packed, tile_b, s, single_buffer_weights)

    # Slice off lane padding and batch padding.
    pred_df = pred_df_pad[:b_total * s, :2].astype(jnp.float32).reshape(b_total, s, 2)
    pred_v = pred_vid_pad[:b_total, :num_class]
    pred_dv = pred_vid_pad[:b_total, num_class:num_class + 2]

    pred_domain_all_source = {"GSD": pred_df[:bs], "GVD": pred_dv[:bs]}
    pred_domain_all_target = {"GSD": pred_df[bs:], "GVD": pred_dv[bs:]}
    return pred_v[:bs], pred_domain_all_source, pred_v[bs:], pred_domain_all_target


def _reference_forward(params, x_bsd):
    """Pure-JAX fp32 reference of the same math (for sanity checking)."""
    b, s, d = x_bsd.shape
    xf = x_bsd.reshape(-1, d)
    h = jnp.maximum(xf @ params["w_shared"] + params["b_shared"], 0.0)
    df = jnp.maximum(h @ params["w_dom"] + params["b_dom"], 0.0)
    pred_df = (df @ params["w_dom_cls"] + params["b_dom_cls"]).reshape(b, s, 2)
    hv = h.reshape(b, s, d).mean(axis=1)
    pred_v = hv @ params["w_vid_cls"] + params["b_vid_cls"]
    dv = jnp.maximum(hv @ params["w_dom_vid"] + params["b_dom_vid"], 0.0)
    pred_dv = dv @ params["w_dom_vid_cls"] + params["b_dom_vid_cls"]
    return pred_df, pred_v, pred_dv


def _max_rel_err(a, b):
    scale = jnp.maximum(jnp.max(jnp.abs(b)), 1e-30)
    return float(jnp.max(jnp.abs(a.astype(jnp.float32) - b)) / scale)


if __name__ == "__main__":
    # Small, module-consistent shapes: (batch, num_segments, feature_dim)
    NUM_CLASS = 8
    NUM_SEGMENTS = 5
    FEATURE_DIM = 128
    BATCH_S = 3
    BATCH_T = 2

    key = jax.random.PRNGKey(0)
    k_src, k_tgt, k_par = jax.random.split(key, 3)
    input_source = jax.random.normal(k_src, (BATCH_S, NUM_SEGMENTS, FEATURE_DIM), jnp.float32)
    input_target = jax.random.normal(k_tgt, (BATCH_T, NUM_SEGMENTS, FEATURE_DIM), jnp.float32)

    params = init_params(k_par, FEATURE_DIM, NUM_CLASS)

    def build_fwd(single_buffer_weights):
        return jax.jit(functools.partial(classifier_forward,
                                         num_segments=NUM_SEGMENTS,
                                         num_class=NUM_CLASS,
                                         single_buffer_weights=single_buffer_weights))

    try:
        fwd = build_fwd(True)
        outs = fwd(params, input_source, input_target)
        outs = jax.block_until_ready(outs)
    except Exception:
        # Fallback if this JAX/Mosaic build rejects pl.Buffered(1) on the
        # constant-weight BlockSpecs: default double-buffering is still correct.
        fwd = build_fwd(False)
        outs = fwd(params, input_source, input_target)
        outs = jax.block_until_ready(outs)
    pred_v_s, dom_s, pred_v_t, dom_t = outs

    # Sanity check against a pure-JAX fp32 reference (kernel runs in bf16 with
    # f32 accumulation -> compare with a relative tolerance).
    TOL = 5e-2
    ref_df_s, ref_v_s, ref_dv_s = _reference_forward(params, input_source)
    ref_df_t, ref_v_t, ref_dv_t = _reference_forward(params, input_target)
    assert _max_rel_err(dom_s["GSD"], ref_df_s) < TOL
    assert _max_rel_err(dom_s["GVD"], ref_dv_s) < TOL
    assert _max_rel_err(pred_v_s, ref_v_s) < TOL
    assert _max_rel_err(dom_t["GSD"], ref_df_t) < TOL
    assert _max_rel_err(dom_t["GVD"], ref_dv_t) < TOL
    assert _max_rel_err(pred_v_t, ref_v_t) < TOL

    # Shape checks vs. the PyTorch module's outputs.
    assert pred_v_s.shape == (BATCH_S, NUM_CLASS)
    assert dom_s["GSD"].shape == (BATCH_S, NUM_SEGMENTS, 2)
    assert dom_s["GVD"].shape == (BATCH_S, 2)
    assert pred_v_t.shape == (BATCH_T, NUM_CLASS)
    assert dom_t["GSD"].shape == (BATCH_T, NUM_SEGMENTS, 2)
    assert dom_t["GVD"].shape == (BATCH_T, 2)

    print("KERNEL_OK")
</pallas_src>

<mosaic_0001>
module attributes {stable_mosaic.version = 11 : i64} {
  func.func @classifier_kernel(%arg0: i32, %arg1: memref<80x128xbf16, #tpu.memory_space<vmem>>, %arg2: memref<16x80xbf16, #tpu.memory_space<vmem>>, %arg3: memref<128x128xbf16, #tpu.memory_space<vmem>>, %arg4: memref<1x128xf32, #tpu.memory_space<vmem>>, %arg5: memref<128x128xbf16, #tpu.memory_space<vmem>>, %arg6: memref<1x128xf32, #tpu.memory_space<vmem>>, %arg7: memref<128x128xbf16, #tpu.memory_space<vmem>>, %arg8: memref<1x128xf32, #tpu.memory_space<vmem>>, %arg9: memref<128x256xbf16, #tpu.memory_space<vmem>>, %arg10: memref<1x256xf32, #tpu.memory_space<vmem>>, %arg11: memref<128x128xbf16, #tpu.memory_space<vmem>>, %arg12: memref<1x128xf32, #tpu.memory_space<vmem>>, %arg13: memref<80x128xbf16, #tpu.memory_space<vmem>>, %arg14: memref<16x128xf32, #tpu.memory_space<vmem>>) attributes {dimension_semantics = [#tpu.dimension_semantics<parallel>], iteration_bounds = array<i64: 1>, scalar_prefetch = 0 : i64, scratch_operands = 0 : i64, tpu.core_type = #tpu.core_type<tc>, window_params = [{transform_indices = @transform_0, window_bounds = array<i64: 80, 128>}, {pipeline_mode = #tpu.pipeline_mode<synchronous>, transform_indices = @transform_1, window_bounds = array<i64: 16, 80>}, {pipeline_mode = #tpu.pipeline_mode<synchronous>, transform_indices = @transform_2, window_bounds = array<i64: 128, 128>}, {pipeline_mode = #tpu.pipeline_mode<synchronous>, transform_indices = @transform_3, window_bounds = array<i64: 1, 128>}, {pipeline_mode = #tpu.pipeline_mode<synchronous>, transform_indices = @transform_4, window_bounds = array<i64: 128, 128>}, {pipeline_mode = #tpu.pipeline_mode<synchronous>, transform_indices = @transform_5, window_bounds = array<i64: 1, 128>}, {pipeline_mode = #tpu.pipeline_mode<synchronous>, transform_indices = @transform_6, window_bounds = array<i64: 128, 128>}, {pipeline_mode = #tpu.pipeline_mode<synchronous>, transform_indices = @transform_7, window_bounds = array<i64: 1, 128>}, {pipeline_mode = #tpu.pipeline_mode<synchronous>, transform_indices = @transform_8, window_bounds = array<i64: 128, 256>}, {pipeline_mode = #tpu.pipeline_mode<synchronous>, transform_indices = @transform_9, window_bounds = array<i64: 1, 256>}, {pipeline_mode = #tpu.pipeline_mode<synchronous>, transform_indices = @transform_10, window_bounds = array<i64: 128, 128>}, {pipeline_mode = #tpu.pipeline_mode<synchronous>, transform_indices = @transform_11, window_bounds = array<i64: 1, 128>}, {transform_indices = @transform_12, window_bounds = array<i64: 80, 128>}, {transform_indices = @transform_13, window_bounds = array<i64: 16, 128>}]} {
    %c0 = arith.constant 0 : index
    %c0_0 = arith.constant 0 : index
    %0 = vector.load %arg1[%c0, %c0_0] : memref<80x128xbf16, #tpu.memory_space<vmem>>, vector<80x128xbf16>
    %c0_1 = arith.constant 0 : index
    %c0_2 = arith.constant 0 : index
    %1 = vector.load %arg3[%c0_1, %c0_2] : memref<128x128xbf16, #tpu.memory_space<vmem>>, vector<128x128xbf16>
    %cst = arith.constant dense<0.000000e+00> : vector<80x128xf32>
    %2 = tpu.matmul %0, %1, %cst {dimension_numbers = #tpu.dot_dimension_numbers<[1], [0], [0], [1], [0, 0, 1, 1], [], []>} : vector<80x128xbf16>, vector<128x128xbf16>, vector<80x128xf32> -> vector<80x128xf32>
    %c0_3 = arith.constant 0 : index
    %c0_4 = arith.constant 0 : index
    %3 = vector.load %arg4[%c0_3, %c0_4] : memref<1x128xf32, #tpu.memory_space<vmem>>, vector<1x128xf32>
    %4 = vector.broadcast %3 : vector<1x128xf32> to vector<80x128xf32>
    %5 = arith.addf %2, %4 : vector<80x128xf32>
    %cst_5 = arith.constant 0.000000e+00 : f32
    %6 = vector.broadcast %cst_5 : f32 to vector<80x128xf32>
    %7 = arith.maximumf %5, %6 : vector<80x128xf32>
    %8 = arith.truncf %7 : vector<80x128xf32> to vector<80x128xbf16>
    %c0_6 = arith.constant 0 : index
    %c0_7 = arith.constant 0 : index
    %9 = vector.load %arg5[%c0_6, %c0_7] : memref<128x128xbf16, #tpu.memory_space<vmem>>, vector<128x128xbf16>
    %cst_8 = arith.constant dense<0.000000e+00> : vector<80x128xf32>
    %10 = tpu.matmul %8, %9, %cst_8 {dimension_numbers = #tpu.dot_dimension_numbers<[1], [0], [0], [1], [0, 0, 1, 1], [], []>} : vector<80x128xbf16>, vector<128x128xbf16>, vector<80x128xf32> -> vector<80x128xf32>
    %c0_9 = arith.constant 0 : index
    %c0_10 = arith.constant 0 : index
    %11 = vector.load %arg6[%c0_9, %c0_10] : memref<1x128xf32, #tpu.memory_space<vmem>>, vector<1x128xf32>
    %12 = vector.broadcast %11 : vector<1x128xf32> to vector<80x128xf32>
    %13 = arith.addf %10, %12 : vector<80x128xf32>
    %cst_11 = arith.constant 0.000000e+00 : f32
    %14 = vector.broadcast %cst_11 : f32 to vector<80x128xf32>
    %15 = arith.maximumf %13, %14 : vector<80x128xf32>
    %16 = arith.truncf %15 : vector<80x128xf32> to vector<80x128xbf16>
    %c0_12 = arith.constant 0 : index
    %c0_13 = arith.constant 0 : index
    %17 = vector.load %arg7[%c0_12, %c0_13] : memref<128x128xbf16, #tpu.memory_space<vmem>>, vector<128x128xbf16>
    %cst_14 = arith.constant dense<0.000000e+00> : vector<80x128xf32>
    %18 = tpu.matmul %16, %17, %cst_14 {dimension_numbers = #tpu.dot_dimension_numbers<[1], [0], [0], [1], [0, 0, 1, 1], [], []>} : vector<80x128xbf16>, vector<128x128xbf16>, vector<80x128xf32> -> vector<80x128xf32>
    %c0_15 = arith.constant 0 : index
    %c0_16 = arith.constant 0 : index
    %19 = vector.load %arg8[%c0_15, %c0_16] : memref<1x128xf32, #tpu.memory_space<vmem>>, vector<1x128xf32>
    %20 = vector.broadcast %19 : vector<1x128xf32> to vector<80x128xf32>
    %21 = arith.addf %18, %20 : vector<80x128xf32>
    %22 = arith.truncf %21 : vector<80x128xf32> to vector<80x128xbf16>
    %c0_17 = arith.constant 0 : index
    %c0_18 = arith.constant 0 : index
    %23 = vector.load %arg13[%c0_17, %c0_18] : memref<80x128xbf16, #tpu.memory_space<vmem>>, vector<80x128xbf16>
    tpu.vector_store %arg13[%c0_17, %c0_18], %22 {strides = array<i32>} : memref<80x128xbf16, #tpu.memory_space<vmem>>, vector<80x128xbf16>,
    %c0_19 = arith.constant 0 : index
    %c0_20 = arith.constant 0 : index
    %24 = vector.load %arg2[%c0_19, %c0_20] : memref<16x80xbf16, #tpu.memory_space<vmem>>, vector<16x80xbf16>
    %cst_21 = arith.constant dense<0.000000e+00> : vector<16x128xf32>
    %25 = tpu.matmul %24, %8, %cst_21 {dimension_numbers = #tpu.dot_dimension_numbers<[1], [0], [0], [1], [0, 0, 1, 1], [], []>} : vector<16x80xbf16>, vector<80x128xbf16>, vector<16x128xf32> -> vector<16x128xf32>
    %cst_22 = arith.constant 2.000000e-01 : f32
    %26 = vector.broadcast %cst_22 : f32 to vector<16x128xf32>
    %27 = arith.mulf %25, %26 : vector<16x128xf32>
    %28 = arith.truncf %27 : vector<16x128xf32> to vector<16x128xbf16>
    %c0_23 = arith.constant 0 : index
    %c0_24 = arith.constant 0 : index
    %29 = vector.load %arg9[%c0_23, %c0_24] : memref<128x256xbf16, #tpu.memory_space<vmem>>, vector<128x256xbf16>
    %cst_25 = arith.constant dense<0.000000e+00> : vector<16x256xf32>
    %30 = tpu.matmul %28, %29, %cst_25 {dimension_numbers = #tpu.dot_dimension_numbers<[1], [0], [0], [1], [0, 0, 1, 1], [], []>} : vector<16x128xbf16>, vector<128x256xbf16>, vector<16x256xf32> -> vector<16x256xf32>
    %c0_26 = arith.constant 0 : index
    %c0_27 = arith.constant 0 : index
    %31 = vector.load %arg10[%c0_26, %c0_27] : memref<1x256xf32, #tpu.memory_space<vmem>>, vector<1x256xf32>
    %32 = vector.broadcast %31 : vector<1x256xf32> to vector<16x256xf32>
    %33 = arith.addf %30, %32 : vector<16x256xf32>
    %34 = vector.extract_strided_slice %33 {offsets = [0, 128], sizes = [16, 128], strides = [1, 1]} : vector<16x256xf32> to vector<16x128xf32>
    %cst_28 = arith.constant 0.000000e+00 : f32
    %35 = vector.broadcast %cst_28 : f32 to vector<16x128xf32>
    %36 = arith.maximumf %34, %35 : vector<16x128xf32>
    %37 = arith.truncf %36 : vector<16x128xf32> to vector<16x128xbf16>
    %c0_29 = arith.constant 0 : index
    %c0_30 = arith.constant 0 : index
    %38 = vector.load %arg11[%c0_29, %c0_30] : memref<128x128xbf16, #tpu.memory_space<vmem>>, vector<128x128xbf16>
    %cst_31 = arith.constant dense<0.000000e+00> : vector<16x128xf32>
    %39 = tpu.matmul %37, %38, %cst_31 {dimension_numbers = #tpu.dot_dimension_numbers<[1], [0], [0], [1], [0, 0, 1, 1], [], []>} : vector<16x128xbf16>, vector<128x128xbf16>, vector<16x128xf32> -> vector<16x128xf32>
    %c0_32 = arith.constant 0 : index
    %c0_33 = arith.constant 0 : index
    %40 = vector.load %arg12[%c0_32, %c0_33] : memref<1x128xf32, #tpu.memory_space<vmem>>, vector<1x128xf32>
    %41 = vector.broadcast %40 : vector<1x128xf32> to vector<16x128xf32>
    %42 = arith.addf %39, %41 : vector<16x128xf32>
    %43 = vector.extract_strided_slice %33 {offsets = [0, 0], sizes = [16, 128], strides = [1, 1]} : vector<16x256xf32> to vector<16x128xf32>
    %44 = arith.addf %43, %42 : vector<16x128xf32>
    %c0_34 = arith.constant 0 : index
    %c0_35 = arith.constant 0 : index
    %45 = vector.load %arg14[%c0_34, %c0_35] : memref<16x128xf32, #tpu.memory_space<vmem>>, vector<16x128xf32>
    tpu.vector_store %arg14[%c0_34, %c0_35], %44 {strides = array<i32>} : memref<16x128xf32, #tpu.memory_space<vmem>>, vector<16x128xf32>,
    return
  }
  func.func @transform_0(%arg0: i32) -> (i32, i32) {
    %c0_i32 = arith.constant 0 : i32
    %c0_i32_0 = arith.constant 0 : i32
    return %arg0, %c0_i32 : i32, i32
  }
  func.func @transform_1(%arg0: i32) -> (i32, i32) {
    %c0_i32 = arith.constant 0 : i32
    %c0_i32_0 = arith.constant 0 : i32
    %c0_i32_1 = arith.constant 0 : i32
    return %c0_i32, %c0_i32_0 : i32, i32
  }
  func.func @transform_2(%arg0: i32) -> (i32, i32) {
    %c0_i32 = arith.constant 0 : i32
    %c0_i32_0 = arith.constant 0 : i32
    %c0_i32_1 = arith.constant 0 : i32
    return %c0_i32, %c0_i32_0 : i32, i32
  }
  func.func @transform_3(%arg0: i32) -> (i32, i32) {
    %c0_i32 = arith.constant 0 : i32
    %c0_i32_0 = arith.constant 0 : i32
    %c0_i32_1 = arith.constant 0 : i32
    return %c0_i32, %c0_i32_0 : i32, i32
  }
  func.func @transform_4(%arg0: i32) -> (i32, i32) {
    %c0_i32 = arith.constant 0 : i32
    %c0_i32_0 = arith.constant 0 : i32
    %c0_i32_1 = arith.constant 0 : i32
    return %c0_i32, %c0_i32_0 : i32, i32
  }
  func.func @transform_5(%arg0: i32) -> (i32, i32) {
    %c0_i32 = arith.constant 0 : i32
    %c0_i32_0 = arith.constant 0 : i32
    %c0_i32_1 = arith.constant 0 : i32
    return %c0_i32, %c0_i32_0 : i32, i32
  }
  func.func @transform_6(%arg0: i32) -> (i32, i32) {
    %c0_i32 = arith.constant 0 : i32
    %c0_i32_0 = arith.constant 0 : i32
    %c0_i32_1 = arith.constant 0 : i32
    return %c0_i32, %c0_i32_0 : i32, i32
  }
  func.func @transform_7(%arg0: i32) -> (i32, i32) {
    %c0_i32 = arith.constant 0 : i32
    %c0_i32_0 = arith.constant 0 : i32
    %c0_i32_1 = arith.constant 0 : i32
    return %c0_i32, %c0_i32_0 : i32, i32
  }
  func.func @transform_8(%arg0: i32) -> (i32, i32) {
    %c0_i32 = arith.constant 0 : i32
    %c0_i32_0 = arith.constant 0 : i32
    %c0_i32_1 = arith.constant 0 : i32
    return %c0_i32, %c0_i32_0 : i32, i32
  }
  func.func @transform_9(%arg0: i32) -> (i32, i32) {
    %c0_i32 = arith.constant 0 : i32
    %c0_i32_0 = arith.constant 0 : i32
    %c0_i32_1 = arith.constant 0 : i32
    return %c0_i32, %c0_i32_0 : i32, i32
  }
  func.func @transform_10(%arg0: i32) -> (i32, i32) {
    %c0_i32 = arith.constant 0 : i32
    %c0_i32_0 = arith.constant 0 : i32
    %c0_i32_1 = arith.constant 0 : i32
    return %c0_i32, %c0_i32_0 : i32, i32
  }
  func.func @transform_11(%arg0: i32) -> (i32, i32) {
    %c0_i32 = arith.constant 0 : i32
    %c0_i32_0 = arith.constant 0 : i32
    %c0_i32_1 = arith.constant 0 : i32
    return %c0_i32, %c0_i32_0 : i32, i32
  }
  func.func @transform_12(%arg0: i32) -> (i32, i32) {
    %c0_i32 = arith.constant 0 : i32
    %c0_i32_0 = arith.constant 0 : i32
    return %arg0, %c0_i32 : i32, i32
  }
  func.func @transform_13(%arg0: i32) -> (i32, i32) {
    %c0_i32 = arith.constant 0 : i32
    %c0_i32_0 = arith.constant 0 : i32
    return %arg0, %c0_i32 : i32, i32
  }
}

module attributes {stable_mosaic.version = 11 : i64} {
  func.func @classifier_kernel(%arg0: i32, %arg1: memref<80x128xbf16, #tpu.memory_space<vmem>>, %arg2: memref<16x80xbf16, #tpu.memory_space<vmem>>, %arg3: memref<128x128xbf16, #tpu.memory_space<vmem>>, %arg4: memref<1x128xf32, #tpu.memory_space<vmem>>, %arg5: memref<128x128xbf16, #tpu.memory_space<vmem>>, %arg6: memref<1x128xf32, #tpu.memory_space<vmem>>, %arg7: memref<128x128xbf16, #tpu.memory_space<vmem>>, %arg8: memref<1x128xf32, #tpu.memory_space<vmem>>, %arg9: memref<128x256xbf16, #tpu.memory_space<vmem>>, %arg10: memref<1x256xf32, #tpu.memory_space<vmem>>, %arg11: memref<128x128xbf16, #tpu.memory_space<vmem>>, %arg12: memref<1x128xf32, #tpu.memory_space<vmem>>, %arg13: memref<80x128xbf16, #tpu.memory_space<vmem>>, %arg14: memref<16x128xf32, #tpu.memory_space<vmem>>) attributes {dimension_semantics = [#tpu.dimension_semantics<parallel>], iteration_bounds = array<i64: 1>, scalar_prefetch = 0 : i64, scratch_operands = 0 : i64, tpu.core_type = #tpu.core_type<tc>, window_params = [{transform_indices = @transform_0, window_bounds = array<i64: 80, 128>}, {pipeline_mode = #tpu.pipeline_mode<synchronous>, transform_indices = @transform_1, window_bounds = array<i64: 16, 80>}, {pipeline_mode = #tpu.pipeline_mode<synchronous>, transform_indices = @transform_2, window_bounds = array<i64: 128, 128>}, {pipeline_mode = #tpu.pipeline_mode<synchronous>, transform_indices = @transform_3, window_bounds = array<i64: 1, 128>}, {pipeline_mode = #tpu.pipeline_mode<synchronous>, transform_indices = @transform_4, window_bounds = array<i64: 128, 128>}, {pipeline_mode = #tpu.pipeline_mode<synchronous>, transform_indices = @transform_5, window_bounds = array<i64: 1, 128>}, {pipeline_mode = #tpu.pipeline_mode<synchronous>, transform_indices = @transform_6, window_bounds = array<i64: 128, 128>}, {pipeline_mode = #tpu.pipeline_mode<synchronous>, transform_indices = @transform_7, window_bounds = array<i64: 1, 128>}, {pipeline_mode = #tpu.pipeline_mode<synchronous>, transform_indices = @transform_8, window_bounds = array<i64: 128, 256>}, {pipeline_mode = #tpu.pipeline_mode<synchronous>, transform_indices = @transform_9, window_bounds = array<i64: 1, 256>}, {pipeline_mode = #tpu.pipeline_mode<synchronous>, transform_indices = @transform_10, window_bounds = array<i64: 128, 128>}, {pipeline_mode = #tpu.pipeline_mode<synchronous>, transform_indices = @transform_11, window_bounds = array<i64: 1, 128>}, {transform_indices = @transform_12, window_bounds = array<i64: 80, 128>}, {transform_indices = @transform_13, window_bounds = array<i64: 16, 128>}]} {
    %c0 = arith.constant 0 : index
    %c0_0 = arith.constant 0 : index
    %0 = vector.load %arg1[%c0, %c0_0] : memref<80x128xbf16, #tpu.memory_space<vmem>>, vector<80x128xbf16>
    %c0_1 = arith.constant 0 : index
    %c0_2 = arith.constant 0 : index
    %1 = vector.load %arg3[%c0_1, %c0_2] : memref<128x128xbf16, #tpu.memory_space<vmem>>, vector<128x128xbf16>
    %cst = arith.constant dense<0.000000e+00> : vector<80x128xf32>
    %2 = tpu.matmul %0, %1, %cst {dimension_numbers = #tpu.dot_dimension_numbers<[1], [0], [0], [1], [0, 0, 1, 1], [], []>} : vector<80x128xbf16>, vector<128x128xbf16>, vector<80x128xf32> -> vector<80x128xf32>
    %c0_3 = arith.constant 0 : index
    %c0_4 = arith.constant 0 : index
    %3 = vector.load %arg4[%c0_3, %c0_4] : memref<1x128xf32, #tpu.memory_space<vmem>>, vector<1x128xf32>
    %4 = vector.broadcast %3 : vector<1x128xf32> to vector<80x128xf32>
    %5 = arith.addf %2, %4 : vector<80x128xf32>
    %cst_5 = arith.constant 0.000000e+00 : f32
    %6 = vector.broadcast %cst_5 : f32 to vector<80x128xf32>
    %7 = arith.maximumf %5, %6 : vector<80x128xf32>
    %8 = arith.truncf %7 : vector<80x128xf32> to vector<80x128xbf16>
    %c0_6 = arith.constant 0 : index
    %c0_7 = arith.constant 0 : index
    %9 = vector.load %arg5[%c0_6, %c0_7] : memref<128x128xbf16, #tpu.memory_space<vmem>>, vector<128x128xbf16>
    %cst_8 = arith.constant dense<0.000000e+00> : vector<80x128xf32>
    %10 = tpu.matmul %8, %9, %cst_8 {dimension_numbers = #tpu.dot_dimension_numbers<[1], [0], [0], [1], [0, 0, 1, 1], [], []>} : vector<80x128xbf16>, vector<128x128xbf16>, vector<80x128xf32> -> vector<80x128xf32>
    %c0_9 = arith.constant 0 : index
    %c0_10 = arith.constant 0 : index
    %11 = vector.load %arg6[%c0_9, %c0_10] : memref<1x128xf32, #tpu.memory_space<vmem>>, vector<1x128xf32>
    %12 = vector.broadcast %11 : vector<1x128xf32> to vector<80x128xf32>
    %13 = arith.addf %10, %12 : vector<80x128xf32>
    %cst_11 = arith.constant 0.000000e+00 : f32
    %14 = vector.broadcast %cst_11 : f32 to vector<80x128xf32>
    %15 = arith.maximumf %13, %14 : vector<80x128xf32>
    %16 = arith.truncf %15 : vector<80x128xf32> to vector<80x128xbf16>
    %c0_12 = arith.constant 0 : index
    %c0_13 = arith.constant 0 : index
    %17 = vector.load %arg7[%c0_12, %c0_13] : memref<128x128xbf16, #tpu.memory_space<vmem>>, vector<128x128xbf16>
    %cst_14 = arith.constant dense<0.000000e+00> : vector<80x128xf32>
    %18 = tpu.matmul %16, %17, %cst_14 {dimension_numbers = #tpu.dot_dimension_numbers<[1], [0], [0], [1], [0, 0, 1, 1], [], []>} : vector<80x128xbf16>, vector<128x128xbf16>, vector<80x128xf32> -> vector<80x128xf32>
    %c0_15 = arith.constant 0 : index
    %c0_16 = arith.constant 0 : index
    %19 = vector.load %arg8[%c0_15, %c0_16] : memref<1x128xf32, #tpu.memory_space<vmem>>, vector<1x128xf32>
    %20 = vector.broadcast %19 : vector<1x128xf32> to vector<80x128xf32>
    %21 = arith.addf %18, %20 : vector<80x128xf32>
    %22 = arith.truncf %21 : vector<80x128xf32> to vector<80x128xbf16>
    %c0_17 = arith.constant 0 : index
    %c0_18 = arith.constant 0 : index
    %23 = vector.load %arg13[%c0_17, %c0_18] : memref<80x128xbf16, #tpu.memory_space<vmem>>, vector<80x128xbf16>
    tpu.vector_store %arg13[%c0_17, %c0_18], %22 {strides = array<i32>} : memref<80x128xbf16, #tpu.memory_space<vmem>>, vector<80x128xbf16>,
    %c0_19 = arith.constant 0 : index
    %c0_20 = arith.constant 0 : index
    %24 = vector.load %arg2[%c0_19, %c0_20] : memref<16x80xbf16, #tpu.memory_space<vmem>>, vector<16x80xbf16>
    %cst_21 = arith.constant dense<0.000000e+00> : vector<16x128xf32>
    %25 = tpu.matmul %24, %8, %cst_21 {dimension_numbers = #tpu.dot_dimension_numbers<[1], [0], [0], [1], [0, 0, 1, 1], [], []>} : vector<16x80xbf16>, vector<80x128xbf16>, vector<16x128xf32> -> vector<16x128xf32>
    %cst_22 = arith.constant 2.000000e-01 : f32
    %26 = vector.broadcast %cst_22 : f32 to vector<16x128xf32>
    %27 = arith.mulf %25, %26 : vector<16x128xf32>
    %28 = arith.truncf %27 : vector<16x128xf32> to vector<16x128xbf16>
    %c0_23 = arith.constant 0 : index
    %c0_24 = arith.constant 0 : index
    %29 = vector.load %arg9[%c0_23, %c0_24] : memref<128x256xbf16, #tpu.memory_space<vmem>>, vector<128x256xbf16>
    %cst_25 = arith.constant dense<0.000000e+00> : vector<16x256xf32>
    %30 = tpu.matmul %28, %29, %cst_25 {dimension_numbers = #tpu.dot_dimension_numbers<[1], [0], [0], [1], [0, 0, 1, 1], [], []>} : vector<16x128xbf16>, vector<128x256xbf16>, vector<16x256xf32> -> vector<16x256xf32>
    %c0_26 = arith.constant 0 : index
    %c0_27 = arith.constant 0 : index
    %31 = vector.load %arg10[%c0_26, %c0_27] : memref<1x256xf32, #tpu.memory_space<vmem>>, vector<1x256xf32>
    %32 = vector.broadcast %31 : vector<1x256xf32> to vector<16x256xf32>
    %33 = arith.addf %30, %32 : vector<16x256xf32>
    %34 = vector.extract_strided_slice %33 {offsets = [0, 128], sizes = [16, 128], strides = [1, 1]} : vector<16x256xf32> to vector<16x128xf32>
    %cst_28 = arith.constant 0.000000e+00 : f32
    %35 = vector.broadcast %cst_28 : f32 to vector<16x128xf32>
    %36 = arith.maximumf %34, %35 : vector<16x128xf32>
    %37 = arith.truncf %36 : vector<16x128xf32> to vector<16x128xbf16>
    %c0_29 = arith.constant 0 : index
    %c0_30 = arith.constant 0 : index
    %38 = vector.load %arg11[%c0_29, %c0_30] : memref<128x128xbf16, #tpu.memory_space<vmem>>, vector<128x128xbf16>
    %cst_31 = arith.constant dense<0.000000e+00> : vector<16x128xf32>
    %39 = tpu.matmul %37, %38, %cst_31 {dimension_numbers = #tpu.dot_dimension_numbers<[1], [0], [0], [1], [0, 0, 1, 1], [], []>} : vector<16x128xbf16>, vector<128x128xbf16>, vector<16x128xf32> -> vector<16x128xf32>
    %c0_32 = arith.constant 0 : index
    %c0_33 = arith.constant 0 : index
    %40 = vector.load %arg12[%c0_32, %c0_33] : memref<1x128xf32, #tpu.memory_space<vmem>>, vector<1x128xf32>
    %41 = vector.broadcast %40 : vector<1x128xf32> to vector<16x128xf32>
    %42 = arith.addf %39, %41 : vector<16x128xf32>
    %43 = vector.extract_strided_slice %33 {offsets = [0, 0], sizes = [16, 128], strides = [1, 1]} : vector<16x256xf32> to vector<16x128xf32>
    %44 = arith.addf %43, %42 : vector<16x128xf32>
    %c0_34 = arith.constant 0 : index
    %c0_35 = arith.constant 0 : index
    %45 = vector.load %arg14[%c0_34, %c0_35] : memref<16x128xf32, #tpu.memory_space<vmem>>, vector<16x128xf32>
    tpu.vector_store %arg14[%c0_34, %c0_35], %44 {strides = array<i32>} : memref<16x128xf32, #tpu.memory_space<vmem>>, vector<16x128xf32>,
    return
  }
  func.func @transform_0(%arg0: i32) -> (i32, i32) {
    %c0_i32 = arith.constant 0 : i32
    %c0_i32_0 = arith.constant 0 : i32
    return %arg0, %c0_i32 : i32, i32
  }
  func.func @transform_1(%arg0: i32) -> (i32, i32) {
    %c0_i32 = arith.constant 0 : i32
    %c0_i32_0 = arith.constant 0 : i32
    %c0_i32_1 = arith.constant 0 : i32
    return %c0_i32, %c0_i32_0 : i32, i32
  }
  func.func @transform_2(%arg0: i32) -> (i32, i32) {
    %c0_i32 = arith.constant 0 : i32
    %c0_i32_0 = arith.constant 0 : i32
    %c0_i32_1 = arith.constant 0 : i32
    return %c0_i32, %c0_i32_0 : i32, i32
  }
  func.func @transform_3(%arg0: i32) -> (i32, i32) {
    %c0_i32 = arith.constant 0 : i32
    %c0_i32_0 = arith.constant 0 : i32
    %c0_i32_1 = arith.constant 0 : i32
    return %c0_i32, %c0_i32_0 : i32, i32
  }
  func.func @transform_4(%arg0: i32) -> (i32, i32) {
    %c0_i32 = arith.constant 0 : i32
    %c0_i32_0 = arith.constant 0 : i32
    %c0_i32_1 = arith.constant 0 : i32
    return %c0_i32, %c0_i32_0 : i32, i32
  }
  func.func @transform_5(%arg0: i32) -> (i32, i32) {
    %c0_i32 = arith.constant 0 : i32
    %c0_i32_0 = arith.constant 0 : i32
    %c0_i32_1 = arith.constant 0 : i32
    return %c0_i32, %c0_i32_0 : i32, i32
  }
  func.func @transform_6(%arg0: i32) -> (i32, i32) {
    %c0_i32 = arith.constant 0 : i32
    %c0_i32_0 = arith.constant 0 : i32
    %c0_i32_1 = arith.constant 0 : i32
    return %c0_i32, %c0_i32_0 : i32, i32
  }
  func.func @transform_7(%arg0: i32) -> (i32, i32) {
    %c0_i32 = arith.constant 0 : i32
    %c0_i32_0 = arith.constant 0 : i32
    %c0_i32_1 = arith.constant 0 : i32
    return %c0_i32, %c0_i32_0 : i32, i32
  }
  func.func @transform_8(%arg0: i32) -> (i32, i32) {
    %c0_i32 = arith.constant 0 : i32
    %c0_i32_0 = arith.constant 0 : i32
    %c0_i32_1 = arith.constant 0 : i32
    return %c0_i32, %c0_i32_0 : i32, i32
  }
  func.func @transform_9(%arg0: i32) -> (i32, i32) {
    %c0_i32 = arith.constant 0 : i32
    %c0_i32_0 = arith.constant 0 : i32
    %c0_i32_1 = arith.constant 0 : i32
    return %c0_i32, %c0_i32_0 : i32, i32
  }
  func.func @transform_10(%arg0: i32) -> (i32, i32) {
    %c0_i32 = arith.constant 0 : i32
    %c0_i32_0 = arith.constant 0 : i32
    %c0_i32_1 = arith.constant 0 : i32
    return %c0_i32, %c0_i32_0 : i32, i32
  }
  func.func @transform_11(%arg0: i32) -> (i32, i32) {
    %c0_i32 = arith.constant 0 : i32
    %c0_i32_0 = arith.constant 0 : i32
    %c0_i32_1 = arith.constant 0 : i32
    return %c0_i32, %c0_i32_0 : i32, i32
  }
  func.func @transform_12(%arg0: i32) -> (i32, i32) {
    %c0_i32 = arith.constant 0 : i32
    %c0_i32_0 = arith.constant 0 : i32
    return %arg0, %c0_i32 : i32, i32
  }
  func.func @transform_13(%arg0: i32) -> (i32, i32) {
    %c0_i32 = arith.constant 0 : i32
    %c0_i32_0 = arith.constant 0 : i32
    return %arg0, %c0_i32 : i32, i32
  }
}

</mosaic_0001>

<bundles_post_ra>
// kernel: classifier_forward.1
= control target key start
LH: loop header
LB: loop body
LE: loop exit
PB: predicated region body
PF: predicated region fallthrough
CT: control target
= control target key end

     0   :  { %v1298_v0 = vmov 0.0   ;;  %vm1299_vm0 = vmmov 0   ;;  %vm603_vm1 = vcmask 654336   ;;  %s1640_s2 = inlined_call_operand.vmem [shape: bf16[128,128], index: 2, kind: input, shape index: {}]   ;;  %s1641_s0 = inlined_call_operand.vmem [shape: bf16[80,128], index: 0, kind: input, shape index: {}]   ;;  %s1642_s4 = inlined_call_operand.vmem [shape: bf16[128,128], index: 4, kind: input, shape index: {}]   ;;  %s1643_s1 = inlined_call_operand.vmem [shape: bf16[16,80], index: 1, kind: input, shape index: {}]   ;;  %s1644_s6 = inlined_call_operand.vmem [shape: bf16[128,128], index: 6, kind: input, shape index: {}]   ;;  %s1645_s3 = inlined_call_operand.vmem [shape: f32[1,128], index: 3, kind: input, shape index: {}]   ;;  %s1646_s8 = inlined_call_operand.vmem [shape: bf16[128,256], index: 8, kind: input, shape index: {}]   ;;  %s1647_s5 = inlined_call_operand.vmem [shape: f32[1,128], index: 5, kind: input, shape index: {}]   ;;  %s1648_s10 = inlined_call_operand.vmem [shape: bf16[128,128], index: 10, kind: input, shape index: {}]   ;;  %s1649_s9 = inlined_call_operand.vmem [shape: f32[1,256], index: 9, kind: input, shape index: {}]   ;;  %s1650_s7 = inlined_call_operand.vmem [shape: f32[1,128], index: 7, kind: input, shape index: {}]   ;;  %s1651_s12 = inlined_call_operand.vmem [shape: bf16[80,128], index: 12, kind: output, shape index: {0}]   ;;  %s1652_s11 = inlined_call_operand.vmem [shape: f32[1,128], index: 11, kind: input, shape index: {}]   ;;  %s1653_s13 = inlined_call_operand.vmem [shape: f32[16,128], index: 13, kind: output, shape index: {1}]  }
   0x1   :  { %1091 = vmatprep.subr.bf16.mxu0 %v1298_v0  ;;  %v1236_v1 = vld [vmem:[%s1640_s2] sm:$0xff]   ;;  %1107 = vmatprep.mubr.msk.bf16.mxu0 %vm1299_vm0, %v1298_v0  ;;  %v1237_v2 = vld [vmem:[%s1640_s2 + $0x8] sm:$0xff]   ;;  %v1238_v3 = vld [vmem:[%s1640_s2 + $0x10] sm:$0xff]  }
   0x2   :  { %1127 = vmatprep.subr.bf16.mxu1 %v1298_v0  ;;  %1143 = vmatprep.mubr.msk.bf16.mxu1 %vm1299_vm0, %v1298_v0  ;;  %v1239_v4 = vld [vmem:[%s1640_s2 + $0x18] sm:$0xff]   ;;  %v1249_v5 = vld [vmem:[%s1642_s4] sm:$0xff]   ;;  %v1250_v7 = vld [vmem:[%s1642_s4 + $0x8] sm:$0xff]  }
   0x3   :  { %1092 = vmatpush3.bf16.msra.mxu0 %v1236_v1  ;;  %v1240_v6 = vld [vmem:[%s1640_s2 + $0x20] sm:$0xff]   ;;  %1128 = vmatpush3.bf16.msra.mxu1 %v1249_v5  ;;  %v1241_v8 = vld [vmem:[%s1640_s2 + $0x28] sm:$0xff]   ;;  %v1251_v9 = vld [vmem:[%s1642_s4 + $0x10] sm:$0xff]  }
   0x4   :  { %1093 = vmatprep.subr.bf16.mxu0 %v1298_v0  ;;  %1129 = vmatprep.subr.bf16.mxu1 %v1298_v0  ;;  %v1242_v10 = vld [vmem:[%s1640_s2 + $0x30] sm:$0xff]   ;;  %v1252_v11 = vld [vmem:[%s1642_s4 + $0x18] sm:$0xff]   ;;  %v1253_v13 = vld [vmem:[%s1642_s4 + $0x20] sm:$0xff]  }
   0x5   :  { %v1243_v12 = vld [vmem:[%s1640_s2 + $0x38] sm:$0xff]   ;;  %v1244_v14 = vld [vmem:[%s1641_s0] sm:$0xff]   ;;  %v1254_v15 = vld [vmem:[%s1642_s4 + $0x28] sm:$0xff]  }
   0x6   :  { %v1245_v16 = vld [vmem:[%s1641_s0 + $0x8] sm:$0xff]   ;;  %v1246_v17 = vld [vmem:[%s1641_s0 + $0x10] sm:$0xff]   ;;  %v1247_v18 = vld [vmem:[%s1641_s0 + $0x18] sm:$0xff]  }
   0x7   :  { %1094 = vmatpush3.bf16.msra.mxu0 %v1237_v2  ;;  %1130 = vmatpush3.bf16.msra.mxu1 %v1250_v7  ;;  %v1248_v19 = vld [vmem:[%s1641_s0 + $0x20] sm:$0xff]   ;;  %v1255_v20 = vld [vmem:[%s1642_s4 + $0x30] sm:$0xff]   ;;  %v1256_v21 = vld [vmem:[%s1642_s4 + $0x38] sm:$0xff]  }
   0x8   :  { %1095 = vmatprep.subr.bf16.mxu0 %v1298_v0  ;;  %1131 = vmatprep.subr.bf16.mxu1 %v1298_v0  ;;  %v1258_v22 = vld [vmem:[%s1644_s6] sm:$0xff]   ;;  %v1259_v23 = vld [vmem:[%s1644_s6 + $0x8] sm:$0xff]   ;;  %v1260_v24 = vld [vmem:[%s1644_s6 + $0x10] sm:$0xff]  }
   0x9   :  { %v1261_v25 = vld [vmem:[%s1644_s6 + $0x18] sm:$0xff]   ;;  %v1262_v26 = vld [vmem:[%s1644_s6 + $0x20] sm:$0xff]   ;;  %v1263_v27 = vld [vmem:[%s1644_s6 + $0x28] sm:$0xff]  }
   0xa   :  { %v929_v28 = vld [vmem:[%s1645_s3] ss:$0 sm:$0xff] }
   0xb   :  { %1096 = vmatpush3.bf16.msra.mxu0 %v1238_v3  ;;  %1132 = vmatpush3.bf16.msra.mxu1 %v1251_v9 }
   0xc   :  { %1097 = vmatprep.subr.bf16.mxu0 %v1298_v0  ;;  %1133 = vmatprep.subr.bf16.mxu1 %v1298_v0 }
   0xf   :  { %1098 = vmatpush3.bf16.msra.mxu0 %v1239_v4  ;;  %1134 = vmatpush3.bf16.msra.mxu1 %v1252_v11  ;;  %v1257_v11 = vld [vmem:[%s1643_s1] sm:$0xff]  }
  0x10   :  { %1099 = vmatprep.subr.bf16.mxu0 %v1298_v0  ;;  %1135 = vmatprep.subr.bf16.mxu1 %v1298_v0 }
  0x13   :  { %1100 = vmatpush3.bf16.msra.mxu0 %v1240_v6  ;;  %1136 = vmatpush3.bf16.msra.mxu1 %v1253_v13  ;;  %v1265_v13 = vld [vmem:[%s1644_s6 + $0x38] sm:$0xff]  }
  0x14   :  { %1101 = vmatprep.subr.bf16.mxu0 %v1298_v0  ;;  %1137 = vmatprep.subr.bf16.mxu1 %v1298_v0 }
  0x17   :  { %1102 = vmatpush3.bf16.msra.mxu0 %v1241_v8  ;;  %1138 = vmatpush3.bf16.msra.mxu1 %v1254_v15  ;;  %v1266_v15 = vld [vmem:[%s1646_s8] ss:$8 sps:$4 sm:$0xff]  }
  0x18   :  { %1103 = vmatprep.subr.bf16.mxu0 %v1298_v0  ;;  %1139 = vmatprep.subr.bf16.mxu1 %v1298_v0 }
  0x1b   :  { %1104 = vmatpush3.bf16.msra.mxu0 %v1242_v10  ;;  %1140 = vmatpush3.bf16.msra.mxu1 %v1255_v20  ;;  %v1277_v20 = vld [vmem:[%s1646_s8 + $0x34] ss:$8 sps:$4 sm:$0xff]  }
  0x1c   :  { %1105 = vmatprep.subr.bf16.mxu0 %v1298_v0  ;;  %1141 = vmatprep.subr.bf16.mxu1 %v1298_v0 }
  0x1f   :  { %1106 = vmatpush3.bf16.msra.mxu0 %v1243_v12  ;;  %1142 = vmatpush3.bf16.msra.mxu1 %v1256_v21  ;;  %v1264_v12 = vld [vmem:[%s1644_s6 + $0x30] sm:$0xff]  }
  0x20   :  { %1163 = vmatprep.subr.bf16.mxu0 %v1298_v0  ;;  %1199 = vmatprep.subr.bf16.mxu1 %v1298_v0  ;;  %v1275_v21 = vld [vmem:[%s1646_s8 + $0x30] ss:$8 sps:$4 sm:$0xff]  }
  0x22   :  { %1108 = vmatmul.mubr.bf16.vlgmr.msra.gmra.mrb[0].mxu0 %v1244_v14  ;;  %v1268_v14 = vld [vmem:[%s1646_s8 + $0x4] ss:$8 sps:$4 sm:$0xff]  }
  0x23   :  { %1111 = vmatprep.mubr.msk.bf16.mxu0 %vm1299_vm0, %v1298_v0  ;;  %1164 = vmatpush3.bf16.msra.mxu0 %v1258_v22  ;;  %v1280_v22 = vld [vmem:[%s1646_s8 + $0x44] ss:$8 sps:$4 sm:$0xff]  }
  0x24   :  { %1165 = vmatprep.subr.bf16.mxu0 %v1298_v0 }
  0x27   :  { %1166 = vmatpush3.bf16.msra.mxu0 %v1259_v23  ;;  %v1278_v23 = vld [vmem:[%s1646_s8 + $0x40] ss:$8 sps:$4 sm:$0xff]  }
  0x28   :  { %1167 = vmatprep.subr.bf16.mxu0 %v1298_v0 }
  0x2a   :  { %1112 = vmatmul.mubr.bf16.gmra.mrb[4].mxu0 %v1245_v16  ;;  %v1271_v16 = vld [vmem:[%s1646_s8 + $0x14] ss:$8 sps:$4 sm:$0xff]  }
  0x2b   :  { %1115 = vmatprep.mubr.msk.bf16.mxu0 %vm1299_vm0, %v1298_v0  ;;  %1168 = vmatpush3.bf16.msra.mxu0 %v1260_v24  ;;  %v1283_v24 = vld [vmem:[%s1646_s8 + $0x54] ss:$8 sps:$4 sm:$0xff]  }
  0x2c   :  { %1169 = vmatprep.subr.bf16.mxu0 %v1298_v0 }
  0x2f   :  { %1170 = vmatpush3.bf16.msra.mxu0 %v1261_v25  ;;  %v1281_v25 = vld [vmem:[%s1646_s8 + $0x50] ss:$8 sps:$4 sm:$0xff]  }
  0x30   :  { %1171 = vmatprep.subr.bf16.mxu0 %v1298_v0 }
  0x32   :  { %1116 = vmatmul.mubr.bf16.gmra.mrb[8].mxu0 %v1246_v17  ;;  %v1269_v17 = vld [vmem:[%s1646_s8 + $0x10] ss:$8 sps:$4 sm:$0xff]  }
  0x33   :  { %1119 = vmatprep.mubr.msk.bf16.mxu0 %vm1299_vm0, %v1298_v0  ;;  %1172 = vmatpush3.bf16.msra.mxu0 %v1262_v26  ;;  %v1286_v26 = vld [vmem:[%s1646_s8 + $0x64] ss:$8 sps:$4 sm:$0xff]  }
  0x34   :  { %1173 = vmatprep.subr.bf16.mxu0 %v1298_v0 }
  0x37   :  { %1174 = vmatpush3.bf16.msra.mxu0 %v1263_v27  ;;  %v1284_v27 = vld [vmem:[%s1646_s8 + $0x60] ss:$8 sps:$4 sm:$0xff]  }
  0x38   :  { %1175 = vmatprep.subr.bf16.mxu0 %v1298_v0 }
  0x3a   :  { %1120 = vmatmul.mubr.bf16.gmra.mrb[12].mxu0 %v1247_v18  ;;  %v1274_v18 = vld [vmem:[%s1646_s8 + $0x24] ss:$8 sps:$4 sm:$0xff]  }
  0x3b   :  { %1123 = vmatprep.mubr.msk.bf16.mxu0 %vm1299_vm0, %v1298_v0  ;;  %1176 = vmatpush3.bf16.msra.mxu0 %v1264_v12 }
  0x3c   :  { %1177 = vmatprep.subr.bf16.mxu0 %v1298_v0 }
  0x3f   :  { %1178 = vmatpush3.bf16.msra.mxu0 %v1265_v13 }
  0x40   :  { %1213 = vmatprep.subr.bf16.mxu0 %v1298_v0 }
  0x42   :  { %1124 = vmatmul.mubr.bf16.gmra.mrb[16].mxu0 %v1248_v19  ;;  %v1272_v19 = vld [vmem:[%s1646_s8 + $0x20] ss:$8 sps:$4 sm:$0xff]  }
  0x43   :  { %1179 = vmatprep.mubr.msk.bf16.mxu0 %vm1299_vm0, %v1298_v0 }
  0xf5   :  { %v189_v29 = vpop.f32.mrb[0].mxu0 }
  0xf6   :  { %v190_v30 = vadd.f32 %v929_v28, %v189_v29  ;;  %v1109_v31 = vpop.f32.mrb[1].mxu0  ;;  %v1287_v29 = vld [vmem:[%s1646_s8 + $0x70] ss:$8 sps:$4 sm:$0xff]  }
  0xf7   :  { %v192_v32 = vpop.f32.mrb[2].mxu0  ;;  %v943_v31 = vld [vmem:[%s1647_s5] ss:$0 sm:$0xff] }
  0xf8   :  { %v193_v33 = vadd.f32 %v929_v28, %v192_v32  ;;  %v1110_v34 = vpop.f32.mrb[3].mxu0  ;;  %v228_v35 = vmax.f32 %v190_v30, 0.0  ;;  %v1300_v30 = vmov 0  }
  0xfa   :  { %v229_v36 = vmax.f32 %v193_v33, 0.0 }
  0xfc   :  { %v238_v37 = vpack.c.bf16 %v229_v36, %v228_v35 }
  0xfd   :  { %v197_v38 = vpop.f32.mrb[4].mxu0 }
  0xfe   :  { %v198_v39 = vadd.f32 %v929_v28, %v197_v38  ;;  %v1113_v40 = vpop.f32.mrb[5].mxu0  ;;  %1144 = vmatmul.mubr.bf16.vlgmr.msra.gmra.mrb[0].mxu1 %v238_v37 }
  0xff   :  { %1200 = vmatpush3.bf16.msra.mxu1 %v238_v37  ;;  %v200_v41 = vpop.f32.mrb[6].mxu0  ;;  %1147 = vmatprep.mubr.msk.bf16.mxu1 %vm1299_vm0, %v1298_v0 }
 0x100   :  { %v201_v42 = vadd.f32 %v929_v28, %v200_v41  ;;  %v1114_v43 = vpop.f32.mrb[7].mxu0  ;;  %1201 = vmatprep.subr.bf16.mxu1 %v1298_v0  ;;  %v230_v44 = vmax.f32 %v198_v39, 0.0 }
 0x102   :  { %v231_v45 = vmax.f32 %v201_v42, 0.0 }
 0x104   :  { %v239_v46 = vpack.c.bf16 %v231_v45, %v230_v44 }
 0x105   :  { %v205_v47 = vpop.f32.mrb[8].mxu0 }
 0x106   :  { %v206_v48 = vadd.f32 %v929_v28, %v205_v47  ;;  %v1117_v49 = vpop.f32.mrb[9].mxu0  ;;  %1148 = vmatmul.mubr.bf16.gmra.mrb[4].mxu1 %v239_v46 }
 0x107   :  { %1202 = vmatpush3.bf16.msra.mxu1 %v239_v46  ;;  %v208_v50 = vpop.f32.mrb[10].mxu0  ;;  %1151 = vmatprep.mubr.msk.bf16.mxu1 %vm1299_vm0, %v1298_v0 }
 0x108   :  { %v209_v51 = vadd.f32 %v929_v28, %v208_v50  ;;  %v1118_v52 = vpop.f32.mrb[11].mxu0  ;;  %1203 = vmatprep.subr.bf16.mxu1 %v1298_v0  ;;  %v232_v53 = vmax.f32 %v206_v48, 0.0 }
 0x10a   :  { %v233_v54 = vmax.f32 %v209_v51, 0.0 }
 0x10c   :  { %v240_v55 = vpack.c.bf16 %v233_v54, %v232_v53 }
 0x10d   :  { %v213_v56 = vpop.f32.mrb[12].mxu0 }
 0x10e   :  { %v214_v57 = vadd.f32 %v929_v28, %v213_v56  ;;  %v1121_v58 = vpop.f32.mrb[13].mxu0  ;;  %1152 = vmatmul.mubr.bf16.gmra.mrb[8].mxu1 %v240_v55 }
 0x10f   :  { %1204 = vmatpush3.bf16.msra.mxu1 %v240_v55  ;;  %v216_v59 = vpop.f32.mrb[14].mxu0  ;;  %1155 = vmatprep.mubr.msk.bf16.mxu1 %vm1299_vm0, %v1298_v0 }
 0x110   :  { %v217_v60 = vadd.f32 %v929_v28, %v216_v59  ;;  %v1122_v61 = vpop.f32.mrb[15].mxu0  ;;  %1205 = vmatprep.subr.bf16.mxu1 %v1298_v0  ;;  %v234_v62 = vmax.f32 %v214_v57, 0.0 }
 0x112   :  { %v235_v63 = vmax.f32 %v217_v60, 0.0 }
 0x114   :  { %v241_v1 = vpack.c.bf16 %v235_v63, %v234_v62 }
 0x115   :  { %v221_v2 = vpop.f32.mrb[16].mxu0 }
 0x116   :  { %v222_v3 = vadd.f32 %v929_v28, %v221_v2  ;;  %v1125_v4 = vpop.f32.mrb[17].mxu0  ;;  %1156 = vmatmul.mubr.bf16.gmra.mrb[12].mxu1 %v241_v1 }
 0x117   :  { %1206 = vmatpush3.bf16.msra.mxu1 %v241_v1  ;;  %v224_v5 = vpop.f32.mrb[18].mxu0  ;;  %1159 = vmatprep.mubr.msk.bf16.mxu1 %vm1299_vm0, %v1298_v0 }
 0x118   :  { %v225_v6 = vadd.f32 %v929_v28, %v224_v5  ;;  %v1126_v7 = vpop.f32.mrb[19].mxu0  ;;  %1207 = vmatprep.subr.bf16.mxu1 %v1298_v0  ;;  %v236_v8 = vmax.f32 %v222_v3, 0.0  ;;  %v1289_v28 = vld [vmem:[%s1646_s8 + $0x74] ss:$8 sps:$4 sm:$0xff]  }
 0x11a   :  { %v237_v9 = vmax.f32 %v225_v6, 0.0 }
 0x11c   :  { %v242_v10 = vpack.c.bf16 %v237_v9, %v236_v8 }
 0x11e   :  { %1160 = vmatmul.mubr.bf16.gmra.mrb[16].mxu1 %v242_v10 }
 0x11f   :  { %1208 = vmatpush3.bf16.msra.mxu1 %v242_v10  ;;  %1209 = vmatprep.mubr.msk.bf16.mxu1 %vm1299_vm0, %v1298_v0 }
 0x120   :  { %759 = vmatprep.subr.bf16.mxu1 %v1268_v14 }
 0x126   :  { %1210 = vmatmul.mubr.msk.bf16.vlgmr.msra.gmra.mrb[20].mxu1 %vm603_vm1, %v1257_v11 }
 0x127   :  { %760 = vmatpush1.bf16.msra.mxu1 %v1266_v15  ;;  %791 = vmatprep.mubr.bf16.mxu1 %v1300_v30  ;;  %v667_v30 = vld [vmem:[%s1649_s9] sm:$0x3] }
 0x128   :  { %761 = vmatprep.subr.bf16.mxu1 %v1271_v16 }
 0x12b   :  { %762 = vmatpush1.bf16.msra.mxu1 %v1269_v17 }
 0x12c   :  { %763 = vmatprep.subr.bf16.mxu1 %v1274_v18 }
 0x12f   :  { %764 = vmatpush1.bf16.msra.mxu1 %v1272_v19 }
 0x130   :  { %765 = vmatprep.subr.bf16.mxu1 %v1277_v20 }
 0x133   :  { %766 = vmatpush1.bf16.msra.mxu1 %v1275_v21  ;;  %v1290_v21 = vld [vmem:[%s1648_s10] sm:$0xff]  }
 0x134   :  { %767 = vmatprep.subr.bf16.mxu1 %v1280_v22  ;;  %v1291_v22 = vld [vmem:[%s1648_s10 + $0x8] sm:$0xff]  }
 0x137   :  { %768 = vmatpush1.bf16.msra.mxu1 %v1278_v23  ;;  %v1292_v23 = vld [vmem:[%s1648_s10 + $0x10] sm:$0xff]  }
 0x138   :  { %769 = vmatprep.subr.bf16.mxu1 %v1283_v24  ;;  %v1293_v24 = vld [vmem:[%s1648_s10 + $0x18] sm:$0xff]  }
 0x13b   :  { %770 = vmatpush1.bf16.msra.mxu1 %v1281_v25  ;;  %v1294_v25 = vld [vmem:[%s1648_s10 + $0x20] sm:$0xff]  }
 0x13c   :  { %771 = vmatprep.subr.bf16.mxu1 %v1286_v26  ;;  %v669_v26 = vlaneseq }
 0x13f   :  { %772 = vmatpush1.bf16.msra.mxu1 %v1284_v27  ;;  %v1295_v27 = vld [vmem:[%s1648_s10 + $0x28] sm:$0xff]  }
 0x140   :  { %773 = vmatprep.subr.bf16.mxu1 %v1289_v28  ;;  %v670_v28 = vshrl.u32 %v669_v26, 7 }
 0x143   :  { %774 = vmatpush1.bf16.msra.mxu1 %v1287_v29  ;;  %v671_v29 = vsub.s32 0, %v670_v28 }
 0x1d1   :  { %v348_v32 = vpop.f32.mrb[0].mxu1 }
 0x1d2   :  { %v349_v33 = vadd.f32 %v943_v31, %v348_v32  ;;  %v1145_v34 = vpop.f32.mrb[1].mxu1  ;;  %v1296_v32 = vld [vmem:[%s1648_s10 + $0x30] sm:$0xff]  }
 0x1d3   :  { %v351_v35 = vpop.f32.mrb[2].mxu1  ;;  %v952_v34 = vld [vmem:[%s1650_s7] ss:$0 sm:$0xff] }
 0x1d4   :  { %v352_v36 = vadd.f32 %v943_v31, %v351_v35  ;;  %v1146_v37 = vpop.f32.mrb[3].mxu1  ;;  %v387_v38 = vmax.f32 %v349_v33, 0.0  ;;  %v1297_v33 = vld [vmem:[%s1648_s10 + $0x38] sm:$0xff]  }
 0x1d6   :  { %v388_v39 = vmax.f32 %v352_v36, 0.0 }
 0x1d8   :  { %v397_v40 = vpack.c.bf16 %v388_v39, %v387_v38 }
 0x1d9   :  { %v356_v41 = vpop.f32.mrb[4].mxu1 }
 0x1da   :  { %v357_v42 = vadd.f32 %v943_v31, %v356_v41  ;;  %v1149_v43 = vpop.f32.mrb[5].mxu1  ;;  %1180 = vmatmul.mubr.bf16.vlgmr.msra.gmra.mrb[20].mxu0 %v397_v40 }
 0x1db   :  { %v359_v44 = vpop.f32.mrb[6].mxu1  ;;  %1183 = vmatprep.mubr.msk.bf16.mxu0 %vm1299_vm0, %v1298_v0  ;;  %1214 = vmatpush3.bf16.msra.mxu0 %v1290_v21 }
 0x1dc   :  { %v360_v45 = vadd.f32 %v943_v31, %v359_v44  ;;  %v1150_v46 = vpop.f32.mrb[7].mxu1  ;;  %v389_v47 = vmax.f32 %v357_v42, 0.0  ;;  %1215 = vmatprep.subr.bf16.mxu0 %v1298_v0 }
 0x1de   :  { %v390_v48 = vmax.f32 %v360_v45, 0.0 }
 0x1df   :  { %1216 = vmatpush3.bf16.msra.mxu0 %v1291_v22 }
 0x1e0   :  { %v398_v49 = vpack.c.bf16 %v390_v48, %v389_v47  ;;  %1217 = vmatprep.subr.bf16.mxu0 %v1298_v0 }
 0x1e1   :  { %v364_v50 = vpop.f32.mrb[8].mxu1 }
 0x1e2   :  { %v365_v51 = vadd.f32 %v943_v31, %v364_v50  ;;  %v1153_v52 = vpop.f32.mrb[9].mxu1  ;;  %1184 = vmatmul.mubr.bf16.gmra.mrb[24].mxu0 %v398_v49 }
 0x1e3   :  { %v367_v53 = vpop.f32.mrb[10].mxu1  ;;  %1187 = vmatprep.mubr.msk.bf16.mxu0 %vm1299_vm0, %v1298_v0  ;;  %1218 = vmatpush3.bf16.msra.mxu0 %v1292_v23 }
 0x1e4   :  { %v368_v54 = vadd.f32 %v943_v31, %v367_v53  ;;  %v1154_v55 = vpop.f32.mrb[11].mxu1  ;;  %v391_v56 = vmax.f32 %v365_v51, 0.0  ;;  %1219 = vmatprep.subr.bf16.mxu0 %v1298_v0 }
 0x1e6   :  { %v392_v57 = vmax.f32 %v368_v54, 0.0 }
 0x1e7   :  { %1220 = vmatpush3.bf16.msra.mxu0 %v1293_v24 }
 0x1e8   :  { %v399_v58 = vpack.c.bf16 %v392_v57, %v391_v56  ;;  %1221 = vmatprep.subr.bf16.mxu0 %v1298_v0 }
 0x1e9   :  { %v372_v59 = vpop.f32.mrb[12].mxu1 }
 0x1ea   :  { %v373_v60 = vadd.f32 %v943_v31, %v372_v59  ;;  %v1157_v61 = vpop.f32.mrb[13].mxu1  ;;  %1188 = vmatmul.mubr.bf16.gmra.mrb[28].mxu0 %v399_v58 }
 0x1eb   :  { %v375_v62 = vpop.f32.mrb[14].mxu1  ;;  %1191 = vmatprep.mubr.msk.bf16.mxu0 %vm1299_vm0, %v1298_v0  ;;  %1222 = vmatpush3.bf16.msra.mxu0 %v1294_v25 }
 0x1ec   :  { %v376_v63 = vadd.f32 %v943_v31, %v375_v62  ;;  %v1158_v1 = vpop.f32.mrb[15].mxu1  ;;  %v393_v2 = vmax.f32 %v373_v60, 0.0  ;;  %1223 = vmatprep.subr.bf16.mxu0 %v1298_v0 }
 0x1ee   :  { %v394_v3 = vmax.f32 %v376_v63, 0.0  ;;  %v675_v63 = vsub.s32 1, %v670_v28 }
 0x1ef   :  { %1224 = vmatpush3.bf16.msra.mxu0 %v1295_v27 }
 0x1f0   :  { %v400_v4 = vpack.c.bf16 %v394_v3, %v393_v2  ;;  %1225 = vmatprep.subr.bf16.mxu0 %v1298_v0 }
 0x1f1   :  { %v380_v5 = vpop.f32.mrb[16].mxu1 }
 0x1f2   :  { %v381_v6 = vadd.f32 %v943_v31, %v380_v5  ;;  %v1161_v7 = vpop.f32.mrb[17].mxu1  ;;  %1192 = vmatmul.mubr.bf16.gmra.mrb[32].mxu0 %v400_v4 }
 0x1f3   :  { %v383_v8 = vpop.f32.mrb[18].mxu1  ;;  %1195 = vmatprep.mubr.msk.bf16.mxu0 %vm1299_vm0, %v1298_v0  ;;  %1226 = vmatpush3.bf16.msra.mxu0 %v1296_v32 }
 0x1f4   :  { %v384_v9 = vadd.f32 %v943_v31, %v383_v8  ;;  %v1162_v10 = vpop.f32.mrb[19].mxu1  ;;  %v395_v11 = vmax.f32 %v381_v6, 0.0  ;;  %v672_v31 = vrot.slane %v667_v30, %v671_v29  ;;  %1227 = vmatprep.subr.bf16.mxu0 %v1298_v0  ;;  %v676_v6 = vrot.slane %v667_v30, %v675_v63 }
 0x1f6   :  { %v396_v12 = vmax.f32 %v384_v9, 0.0 }
 0x1f7   :  { %1228 = vmatpush3.bf16.msra.mxu0 %v1297_v33 }
 0x1f8   :  { %v401_v13 = vpack.c.bf16 %v396_v12, %v395_v11 }
 0x1f9   :  { %v641_v14 = vpop.f32.mrb[20].mxu1 }
 0x1fa   :  { %1196 = vmatmul.mubr.bf16.gmra.mrb[36].mxu0 %v401_v13  ;;  %v1211_v15 = vpop.f32.mrb[21].mxu1  ;;  %v648_v17 = vmul.f32 0.2, %v641_v14 }
 0x1fb   :  { %v644_v16 = vpop.f32.mrb[22].mxu1  ;;  %1229 = vmatprep.mubr.msk.bf16.mxu0 %vm1299_vm0, %v1298_v0 }
 0x1fc   :  { %v649_v18 = vmul.f32 0.2, %v644_v16  ;;  %v1212_v19 = vpop.f32.mrb[23].mxu1 }
 0x1fd   :  { %v989_v19 = vld [vmem:[%s1652_s11] ss:$0 sm:$0xff] }
 0x1fe   :  { %v650_v20 = vpack.c.bf16 %v649_v18, %v648_v17 }
 0x200   :  { %792 = vmatmul.mubr.bf16.vlgmr.msra.gmra.mrb[24].mxu1 %v650_v20 }
 0x2ad   :  { %v507_v35 = vpop.f32.mrb[20].mxu0 }
 0x2ae   :  { %v1181_v36 = vpop.f32.mrb[21].mxu0  ;;  %v508_v38 = vadd.f32 %v952_v34, %v507_v35 }
 0x2af   :  { %v510_v37 = vpop.f32.mrb[22].mxu0 }
 0x2b0   :  { %v511_v39 = vadd.f32 %v952_v34, %v510_v37  ;;  %v1182_v40 = vpop.f32.mrb[23].mxu0 }
 0x2b2   :  { %v1011_v41 = vpack.c.bf16 %v511_v39, %v508_v38 }
 0x2b4   :  { %1012 = vst [vmem:[%s1651_s12] sm:$0xff] %v1011_v41  }
 0x2b5   :  { %v515_v0 = vpop.f32.mrb[24].mxu0 }
 0x2b6   :  { %v1185_v42 = vpop.f32.mrb[25].mxu0  ;;  %v516_v44 = vadd.f32 %v952_v34, %v515_v0 }
 0x2b7   :  { %v518_v43 = vpop.f32.mrb[26].mxu0 }
 0x2b8   :  { %v519_v45 = vadd.f32 %v952_v34, %v518_v43  ;;  %v1186_v46 = vpop.f32.mrb[27].mxu0 }
 0x2ba   :  { %v1016_v47 = vpack.c.bf16 %v519_v45, %v516_v44 }
 0x2bc   :  { %1033 = vst [vmem:[%s1651_s12 + $0x8] sm:$0xff] %v1016_v47  }
 0x2bd   :  { %v523_v48 = vpop.f32.mrb[28].mxu0 }
 0x2be   :  { %v1189_v49 = vpop.f32.mrb[29].mxu0  ;;  %v524_v51 = vadd.f32 %v952_v34, %v523_v48 }
 0x2bf   :  { %v526_v50 = vpop.f32.mrb[30].mxu0 }
 0x2c0   :  { %v527_v52 = vadd.f32 %v952_v34, %v526_v50  ;;  %v1190_v53 = vpop.f32.mrb[31].mxu0 }
 0x2c2   :  { %v1021_v54 = vpack.c.bf16 %v527_v52, %v524_v51 }
 0x2c4   :  { %1034 = vst [vmem:[%s1651_s12 + $0x10] sm:$0xff] %v1021_v54  }
 0x2c5   :  { %v531_v55 = vpop.f32.mrb[32].mxu0 }
 0x2c6   :  { %v1193_v56 = vpop.f32.mrb[33].mxu0  ;;  %v532_v58 = vadd.f32 %v952_v34, %v531_v55 }
 0x2c7   :  { %v534_v57 = vpop.f32.mrb[34].mxu0 }
 0x2c8   :  { %v535_v59 = vadd.f32 %v952_v34, %v534_v57  ;;  %v1194_v60 = vpop.f32.mrb[35].mxu0 }
 0x2ca   :  { %v1026_v61 = vpack.c.bf16 %v535_v59, %v532_v58 }
 0x2cc   :  { %1035 = vst [vmem:[%s1651_s12 + $0x18] sm:$0xff] %v1026_v61  }
 0x2cd   :  { %v539_v62 = vpop.f32.mrb[36].mxu0 }
 0x2ce   :  { %v1197_v1 = vpop.f32.mrb[37].mxu0  ;;  %v540_v3 = vadd.f32 %v952_v34, %v539_v62 }
 0x2cf   :  { %v542_v2 = vpop.f32.mrb[38].mxu0 }
 0x2d0   :  { %v543_v4 = vadd.f32 %v952_v34, %v542_v2  ;;  %v1198_v5 = vpop.f32.mrb[39].mxu0 }
 0x2d2   :  { %v1031_v7 = vpack.c.bf16 %v543_v4, %v540_v3 }
 0x2d3   :  { %v793_v8 = vpop.f32.mrb[24].mxu1 }
 0x2d4   :  { %1036 = vst [vmem:[%s1651_s12 + $0x20] sm:$0xff] %v1031_v7   ;;  %v794_v9 = vadd.f32 %v793_v8, %v672_v31  ;;  %v795_v10 = vpop.f32.mrb[25].mxu1 }
 0x2d5   :  { %v796_v11 = vadd.f32 %v795_v10, %v676_v6  ;;  %v797_v12 = vpop.f32.mrb[26].mxu1 }
 0x2d6   :  { %v798_v13 = vadd.f32 %v797_v12, %v672_v31  ;;  %v799_v14 = vpop.f32.mrb[27].mxu1 }
 0x2d7   :  { %v800_v15 = vadd.f32 %v799_v14, %v676_v6  ;;  %v802_v16 = vmax.f32 %v796_v11, 0.0 }
 0x2d9   :  { %v803_v17 = vmax.f32 %v800_v15, 0.0 }
 0x2db   :  { %v804_v18 = vpack.c.bf16 %v803_v17, %v802_v16 }
 0x2dd   :  { %1230 = vmatmul.mubr.bf16.vlgmr.msra.gmra.mrb[40].mxu0 %v804_v18 }
 0x3b0   :  { %v910_v20 = vpop.f32.mrb[40].mxu0 }
 0x3b1   :  { %v911_v21 = vadd.f32 %v989_v19, %v910_v20  ;;  %v1231_v22 = vpop.f32.mrb[41].mxu0 }
 0x3b2   :  { %v913_v23 = vpop.f32.mrb[42].mxu0 }
 0x3b3   :  { %v917_v24 = vadd.f32 %v911_v21, %v794_v9  ;;  %v914_v25 = vadd.f32 %v989_v19, %v913_v23  ;;  %v1232_v26 = vpop.f32.mrb[43].mxu0 }
 0x3b5   :  { %919 = vst [vmem:[%s1653_s13] sm:$0xff] %v917_v24  ;;  %v918_v27 = vadd.f32 %v914_v25, %v798_v13 }
 0x3b7   :  { %920 = vst [vmem:[%s1653_s13 + $0x8] sm:$0xff] %v918_v27 }

// kernel: classifier_forward.1
= control target key start
LH: loop header
LB: loop body
LE: loop exit
PB: predicated region body
PF: predicated region fallthrough
CT: control target
= control target key end

     0   :  { %v1298_v0 = vmov 0.0   ;;  %vm1299_vm0 = vmmov 0   ;;  %vm603_vm1 = vcmask 654336   ;;  %s1640_s2 = inlined_call_operand.vmem [shape: bf16[128,128], index: 2, kind: input, shape index: {}]   ;;  %s1641_s0 = inlined_call_operand.vmem [shape: bf16[80,128], index: 0, kind: input, shape index: {}]   ;;  %s1642_s4 = inlined_call_operand.vmem [shape: bf16[128,128], index: 4, kind: input, shape index: {}]   ;;  %s1643_s1 = inlined_call_operand.vmem [shape: bf16[16,80], index: 1, kind: input, shape index: {}]   ;;  %s1644_s6 = inlined_call_operand.vmem [shape: bf16[128,128], index: 6, kind: input, shape index: {}]   ;;  %s1645_s3 = inlined_call_operand.vmem [shape: f32[1,128], index: 3, kind: input, shape index: {}]   ;;  %s1646_s8 = inlined_call_operand.vmem [shape: bf16[128,256], index: 8, kind: input, shape index: {}]   ;;  %s1647_s5 = inlined_call_operand.vmem [shape: f32[1,128], index: 5, kind: input, shape index: {}]   ;;  %s1648_s10 = inlined_call_operand.vmem [shape: bf16[128,128], index: 10, kind: input, shape index: {}]   ;;  %s1649_s9 = inlined_call_operand.vmem [shape: f32[1,256], index: 9, kind: input, shape index: {}]   ;;  %s1650_s7 = inlined_call_operand.vmem [shape: f32[1,128], index: 7, kind: input, shape index: {}]   ;;  %s1651_s12 = inlined_call_operand.vmem [shape: bf16[80,128], index: 12, kind: output, shape index: {0}]   ;;  %s1652_s11 = inlined_call_operand.vmem [shape: f32[1,128], index: 11, kind: input, shape index: {}]   ;;  %s1653_s13 = inlined_call_operand.vmem [shape: f32[16,128], index: 13, kind: output, shape index: {1}]  }
   0x1   :  { %1091 = vmatprep.subr.bf16.mxu0 %v1298_v0  ;;  %v1236_v1 = vld [vmem:[%s1640_s2] sm:$0xff]   ;;  %1107 = vmatprep.mubr.msk.bf16.mxu0 %vm1299_vm0, %v1298_v0  ;;  %v1237_v2 = vld [vmem:[%s1640_s2 + $0x8] sm:$0xff]   ;;  %v1238_v3 = vld [vmem:[%s1640_s2 + $0x10] sm:$0xff]  }
   0x2   :  { %1127 = vmatprep.subr.bf16.mxu1 %v1298_v0  ;;  %1143 = vmatprep.mubr.msk.bf16.mxu1 %vm1299_vm0, %v1298_v0  ;;  %v1239_v4 = vld [vmem:[%s1640_s2 + $0x18] sm:$0xff]   ;;  %v1249_v5 = vld [vmem:[%s1642_s4] sm:$0xff]   ;;  %v1250_v7 = vld [vmem:[%s1642_s4 + $0x8] sm:$0xff]  }
   0x3   :  { %1092 = vmatpush3.bf16.msra.mxu0 %v1236_v1  ;;  %v1240_v6 = vld [vmem:[%s1640_s2 + $0x20] sm:$0xff]   ;;  %1128 = vmatpush3.bf16.msra.mxu1 %v1249_v5  ;;  %v1241_v8 = vld [vmem:[%s1640_s2 + $0x28] sm:$0xff]   ;;  %v1251_v9 = vld [vmem:[%s1642_s4 + $0x10] sm:$0xff]  }
   0x4   :  { %1093 = vmatprep.subr.bf16.mxu0 %v1298_v0  ;;  %1129 = vmatprep.subr.bf16.mxu1 %v1298_v0  ;;  %v1242_v10 = vld [vmem:[%s1640_s2 + $0x30] sm:$0xff]   ;;  %v1252_v11 = vld [vmem:[%s1642_s4 + $0x18] sm:$0xff]   ;;  %v1253_v13 = vld [vmem:[%s1642_s4 + $0x20] sm:$0xff]  }
   0x5   :  { %v1243_v12 = vld [vmem:[%s1640_s2 + $0x38] sm:$0xff]   ;;  %v1244_v14 = vld [vmem:[%s1641_s0] sm:$0xff]   ;;  %v1254_v15 = vld [vmem:[%s1642_s4 + $0x28] sm:$0xff]  }
   0x6   :  { %v1245_v16 = vld [vmem:[%s1641_s0 + $0x8] sm:$0xff]   ;;  %v1246_v17 = vld [vmem:[%s1641_s0 + $0x10] sm:$0xff]   ;;  %v1247_v18 = vld [vmem:[%s1641_s0 + $0x18] sm:$0xff]  }
   0x7   :  { %1094 = vmatpush3.bf16.msra.mxu0 %v1237_v2  ;;  %1130 = vmatpush3.bf16.msra.mxu1 %v1250_v7  ;;  %v1248_v19 = vld [vmem:[%s1641_s0 + $0x20] sm:$0xff]   ;;  %v1255_v20 = vld [vmem:[%s1642_s4 + $0x30] sm:$0xff]   ;;  %v1256_v21 = vld [vmem:[%s1642_s4 + $0x38] sm:$0xff]  }
   0x8   :  { %1095 = vmatprep.subr.bf16.mxu0 %v1298_v0  ;;  %1131 = vmatprep.subr.bf16.mxu1 %v1298_v0  ;;  %v1258_v22 = vld [vmem:[%s1644_s6] sm:$0xff]   ;;  %v1259_v23 = vld [vmem:[%s1644_s6 + $0x8] sm:$0xff]   ;;  %v1260_v24 = vld [vmem:[%s1644_s6 + $0x10] sm:$0xff]  }
   0x9   :  { %v1261_v25 = vld [vmem:[%s1644_s6 + $0x18] sm:$0xff]   ;;  %v1262_v26 = vld [vmem:[%s1644_s6 + $0x20] sm:$0xff]   ;;  %v1263_v27 = vld [vmem:[%s1644_s6 + $0x28] sm:$0xff]  }
   0xa   :  { %v929_v28 = vld [vmem:[%s1645_s3] ss:$0 sm:$0xff] }
   0xb   :  { %1096 = vmatpush3.bf16.msra.mxu0 %v1238_v3  ;;  %1132 = vmatpush3.bf16.msra.mxu1 %v1251_v9 }
   0xc   :  { %1097 = vmatprep.subr.bf16.mxu0 %v1298_v0  ;;  %1133 = vmatprep.subr.bf16.mxu1 %v1298_v0 }
   0xf   :  { %1098 = vmatpush3.bf16.msra.mxu0 %v1239_v4  ;;  %1134 = vmatpush3.bf16.msra.mxu1 %v1252_v11  ;;  %v1257_v11 = vld [vmem:[%s1643_s1] sm:$0xff]  }
  0x10   :  { %1099 = vmatprep.subr.bf16.mxu0 %v1298_v0  ;;  %1135 = vmatprep.subr.bf16.mxu1 %v1298_v0 }
  0x13   :  { %1100 = vmatpush3.bf16.msra.mxu0 %v1240_v6  ;;  %1136 = vmatpush3.bf16.msra.mxu1 %v1253_v13  ;;  %v1265_v13 = vld [vmem:[%s1644_s6 + $0x38] sm:$0xff]  }
  0x14   :  { %1101 = vmatprep.subr.bf16.mxu0 %v1298_v0  ;;  %1137 = vmatprep.subr.bf16.mxu1 %v1298_v0 }
  0x17   :  { %1102 = vmatpush3.bf16.msra.mxu0 %v1241_v8  ;;  %1138 = vmatpush3.bf16.msra.mxu1 %v1254_v15  ;;  %v1266_v15 = vld [vmem:[%s1646_s8] ss:$8 sps:$4 sm:$0xff]  }
  0x18   :  { %1103 = vmatprep.subr.bf16.mxu0 %v1298_v0  ;;  %1139 = vmatprep.subr.bf16.mxu1 %v1298_v0 }
  0x1b   :  { %1104 = vmatpush3.bf16.msra.mxu0 %v1242_v10  ;;  %1140 = vmatpush3.bf16.msra.mxu1 %v1255_v20  ;;  %v1277_v20 = vld [vmem:[%s1646_s8 + $0x34] ss:$8 sps:$4 sm:$0xff]  }
  0x1c   :  { %1105 = vmatprep.subr.bf16.mxu0 %v1298_v0  ;;  %1141 = vmatprep.subr.bf16.mxu1 %v1298_v0 }
  0x1f   :  { %1106 = vmatpush3.bf16.msra.mxu0 %v1243_v12  ;;  %1142 = vmatpush3.bf16.msra.mxu1 %v1256_v21  ;;  %v1264_v12 = vld [vmem:[%s1644_s6 + $0x30] sm:$0xff]  }
  0x20   :  { %1163 = vmatprep.subr.bf16.mxu0 %v1298_v0  ;;  %1199 = vmatprep.subr.bf16.mxu1 %v1298_v0  ;;  %v1275_v21 = vld [vmem:[%s1646_s8 + $0x30] ss:$8 sps:$4 sm:$0xff]  }
  0x22   :  { %1108 = vmatmul.mubr.bf16.vlgmr.msra.gmra.mrb[0].mxu0 %v1244_v14  ;;  %v1268_v14 = vld [vmem:[%s1646_s8 + $0x4] ss:$8 sps:$4 sm:$0xff]  }
  0x23   :  { %1111 = vmatprep.mubr.msk.bf16.mxu0 %vm1299_vm0, %v1298_v0  ;;  %1164 = vmatpush3.bf16.msra.mxu0 %v1258_v22  ;;  %v1280_v22 = vld [vmem:[%s1646_s8 + $0x44] ss:$8 sps:$4 sm:$0xff]  }
  0x24   :  { %1165 = vmatprep.subr.bf16.mxu0 %v1298_v0 }
  0x27   :  { %1166 = vmatpush3.bf16.msra.mxu0 %v1259_v23  ;;  %v1278_v23 = vld [vmem:[%s1646_s8 + $0x40] ss:$8 sps:$4 sm:$0xff]  }
  0x28   :  { %1167 = vmatprep.subr.bf16.mxu0 %v1298_v0 }
  0x2a   :  { %1112 = vmatmul.mubr.bf16.gmra.mrb[4].mxu0 %v1245_v16  ;;  %v1271_v16 = vld [vmem:[%s1646_s8 + $0x14] ss:$8 sps:$4 sm:$0xff]  }
  0x2b   :  { %1115 = vmatprep.mubr.msk.bf16.mxu0 %vm1299_vm0, %v1298_v0  ;;  %1168 = vmatpush3.bf16.msra.mxu0 %v1260_v24  ;;  %v1283_v24 = vld [vmem:[%s1646_s8 + $0x54] ss:$8 sps:$4 sm:$0xff]  }
  0x2c   :  { %1169 = vmatprep.subr.bf16.mxu0 %v1298_v0 }
  0x2f   :  { %1170 = vmatpush3.bf16.msra.mxu0 %v1261_v25  ;;  %v1281_v25 = vld [vmem:[%s1646_s8 + $0x50] ss:$8 sps:$4 sm:$0xff]  }
  0x30   :  { %1171 = vmatprep.subr.bf16.mxu0 %v1298_v0 }
  0x32   :  { %1116 = vmatmul.mubr.bf16.gmra.mrb[8].mxu0 %v1246_v17  ;;  %v1269_v17 = vld [vmem:[%s1646_s8 + $0x10] ss:$8 sps:$4 sm:$0xff]  }
  0x33   :  { %1119 = vmatprep.mubr.msk.bf16.mxu0 %vm1299_vm0, %v1298_v0  ;;  %1172 = vmatpush3.bf16.msra.mxu0 %v1262_v26  ;;  %v1286_v26 = vld [vmem:[%s1646_s8 + $0x64] ss:$8 sps:$4 sm:$0xff]  }
  0x34   :  { %1173 = vmatprep.subr.bf16.mxu0 %v1298_v0 }
  0x37   :  { %1174 = vmatpush3.bf16.msra.mxu0 %v1263_v27  ;;  %v1284_v27 = vld [vmem:[%s1646_s8 + $0x60] ss:$8 sps:$4 sm:$0xff]  }
  0x38   :  { %1175 = vmatprep.subr.bf16.mxu0 %v1298_v0 }
  0x3a   :  { %1120 = vmatmul.mubr.bf16.gmra.mrb[12].mxu0 %v1247_v18  ;;  %v1274_v18 = vld [vmem:[%s1646_s8 + $0x24] ss:$8 sps:$4 sm:$0xff]  }
  0x3b   :  { %1123 = vmatprep.mubr.msk.bf16.mxu0 %vm1299_vm0, %v1298_v0  ;;  %1176 = vmatpush3.bf16.msra.mxu0 %v1264_v12 }
  0x3c   :  { %1177 = vmatprep.subr.bf16.mxu0 %v1298_v0 }
  0x3f   :  { %1178 = vmatpush3.bf16.msra.mxu0 %v1265_v13 }
  0x40   :  { %1213 = vmatprep.subr.bf16.mxu0 %v1298_v0 }
  0x42   :  { %1124 = vmatmul.mubr.bf16.gmra.mrb[16].mxu0 %v1248_v19  ;;  %v1272_v19 = vld [vmem:[%s1646_s8 + $0x20] ss:$8 sps:$4 sm:$0xff]  }
  0x43   :  { %1179 = vmatprep.mubr.msk.bf16.mxu0 %vm1299_vm0, %v1298_v0 }
  0xf5   :  { %v189_v29 = vpop.f32.mrb[0].mxu0 }
  0xf6   :  { %v190_v30 = vadd.f32 %v929_v28, %v189_v29  ;;  %v1109_v31 = vpop.f32.mrb[1].mxu0  ;;  %v1287_v29 = vld [vmem:[%s1646_s8 + $0x70] ss:$8 sps:$4 sm:$0xff]  }
  0xf7   :  { %v192_v32 = vpop.f32.mrb[2].mxu0  ;;  %v943_v31 = vld [vmem:[%s1647_s5] ss:$0 sm:$0xff] }
  0xf8   :  { %v193_v33 = vadd.f32 %v929_v28, %v192_v32  ;;  %v1110_v34 = vpop.f32.mrb[3].mxu0  ;;  %v228_v35 = vmax.f32 %v190_v30, 0.0  ;;  %v1300_v30 = vmov 0  }
  0xfa   :  { %v229_v36 = vmax.f32 %v193_v33, 0.0 }
  0xfc   :  { %v238_v37 = vpack.c.bf16 %v229_v36, %v228_v35 }
  0xfd   :  { %v197_v38 = vpop.f32.mrb[4].mxu0 }
  0xfe   :  { %v198_v39 = vadd.f32 %v929_v28, %v197_v38  ;;  %v1113_v40 = vpop.f32.mrb[5].mxu0  ;;  %1144 = vmatmul.mubr.bf16.vlgmr.msra.gmra.mrb[0].mxu1 %v238_v37 }
  0xff   :  { %1200 = vmatpush3.bf16.msra.mxu1 %v238_v37  ;;  %v200_v41 = vpop.f32.mrb[6].mxu0  ;;  %1147 = vmatprep.mubr.msk.bf16.mxu1 %vm1299_vm0, %v1298_v0 }
 0x100   :  { %v201_v42 = vadd.f32 %v929_v28, %v200_v41  ;;  %v1114_v43 = vpop.f32.mrb[7].mxu0  ;;  %1201 = vmatprep.subr.bf16.mxu1 %v1298_v0  ;;  %v230_v44 = vmax.f32 %v198_v39, 0.0 }
 0x102   :  { %v231_v45 = vmax.f32 %v201_v42, 0.0 }
 0x104   :  { %v239_v46 = vpack.c.bf16 %v231_v45, %v230_v44 }
 0x105   :  { %v205_v47 = vpop.f32.mrb[8].mxu0 }
 0x106   :  { %v206_v48 = vadd.f32 %v929_v28, %v205_v47  ;;  %v1117_v49 = vpop.f32.mrb[9].mxu0  ;;  %1148 = vmatmul.mubr.bf16.gmra.mrb[4].mxu1 %v239_v46 }
 0x107   :  { %1202 = vmatpush3.bf16.msra.mxu1 %v239_v46  ;;  %v208_v50 = vpop.f32.mrb[10].mxu0  ;;  %1151 = vmatprep.mubr.msk.bf16.mxu1 %vm1299_vm0, %v1298_v0 }
 0x108   :  { %v209_v51 = vadd.f32 %v929_v28, %v208_v50  ;;  %v1118_v52 = vpop.f32.mrb[11].mxu0  ;;  %1203 = vmatprep.subr.bf16.mxu1 %v1298_v0  ;;  %v232_v53 = vmax.f32 %v206_v48, 0.0 }
 0x10a   :  { %v233_v54 = vmax.f32 %v209_v51, 0.0 }
 0x10c   :  { %v240_v55 = vpack.c.bf16 %v233_v54, %v232_v53 }
 0x10d   :  { %v213_v56 = vpop.f32.mrb[12].mxu0 }
 0x10e   :  { %v214_v57 = vadd.f32 %v929_v28, %v213_v56  ;;  %v1121_v58 = vpop.f32.mrb[13].mxu0  ;;  %1152 = vmatmul.mubr.bf16.gmra.mrb[8].mxu1 %v240_v55 }
 0x10f   :  { %1204 = vmatpush3.bf16.msra.mxu1 %v240_v55  ;;  %v216_v59 = vpop.f32.mrb[14].mxu0  ;;  %1155 = vmatprep.mubr.msk.bf16.mxu1 %vm1299_vm0, %v1298_v0 }
 0x110   :  { %v217_v60 = vadd.f32 %v929_v28, %v216_v59  ;;  %v1122_v61 = vpop.f32.mrb[15].mxu0  ;;  %1205 = vmatprep.subr.bf16.mxu1 %v1298_v0  ;;  %v234_v62 = vmax.f32 %v214_v57, 0.0 }
 0x112   :  { %v235_v63 = vmax.f32 %v217_v60, 0.0 }
 0x114   :  { %v241_v1 = vpack.c.bf16 %v235_v63, %v234_v62 }
 0x115   :  { %v221_v2 = vpop.f32.mrb[16].mxu0 }
 0x116   :  { %v222_v3 = vadd.f32 %v929_v28, %v221_v2  ;;  %v1125_v4 = vpop.f32.mrb[17].mxu0  ;;  %1156 = vmatmul.mubr.bf16.gmra.mrb[12].mxu1 %v241_v1 }
 0x117   :  { %1206 = vmatpush3.bf16.msra.mxu1 %v241_v1  ;;  %v224_v5 = vpop.f32.mrb[18].mxu0  ;;  %1159 = vmatprep.mubr.msk.bf16.mxu1 %vm1299_vm0, %v1298_v0 }
 0x118   :  { %v225_v6 = vadd.f32 %v929_v28, %v224_v5  ;;  %v1126_v7 = vpop.f32.mrb[19].mxu0  ;;  %1207 = vmatprep.subr.bf16.mxu1 %v1298_v0  ;;  %v236_v8 = vmax.f32 %v222_v3, 0.0  ;;  %v1289_v28 = vld [vmem:[%s1646_s8 + $0x74] ss:$8 sps:$4 sm:$0xff]  }
 0x11a   :  { %v237_v9 = vmax.f32 %v225_v6, 0.0 }
 0x11c   :  { %v242_v10 = vpack.c.bf16 %v237_v9, %v236_v8 }
 0x11e   :  { %1160 = vmatmul.mubr.bf16.gmra.mrb[16].mxu1 %v242_v10 }
 0x11f   :  { %1208 = vmatpush3.bf16.msra.mxu1 %v242_v10  ;;  %1209 = vmatprep.mubr.msk.bf16.mxu1 %vm1299_vm0, %v1298_v0 }
 0x120   :  { %759 = vmatprep.subr.bf16.mxu1 %v1268_v14 }
 0x126   :  { %1210 = vmatmul.mubr.msk.bf16.vlgmr.msra.gmra.mrb[20].mxu1 %vm603_vm1, %v1257_v11 }
 0x127   :  { %760 = vmatpush1.bf16.msra.mxu1 %v1266_v15  ;;  %791 = vmatprep.mubr.bf16.mxu1 %v1300_v30  ;;  %v667_v30 = vld [vmem:[%s1649_s9] sm:$0x3] }
 0x128   :  { %761 = vmatprep.subr.bf16.mxu1 %v1271_v16 }
 0x12b   :  { %762 = vmatpush1.bf16.msra.mxu1 %v1269_v17 }
 0x12c   :  { %763 = vmatprep.subr.bf16.mxu1 %v1274_v18 }
 0x12f   :  { %764 = vmatpush1.bf16.msra.mxu1 %v1272_v19 }
 0x130   :  { %765 = vmatprep.subr.bf16.mxu1 %v1277_v20 }
 0x133   :  { %766 = vmatpush1.bf16.msra.mxu1 %v1275_v21  ;;  %v1290_v21 = vld [vmem:[%s1648_s10] sm:$0xff]  }
 0x134   :  { %767 = vmatprep.subr.bf16.mxu1 %v1280_v22  ;;  %v1291_v22 = vld [vmem:[%s1648_s10 + $0x8] sm:$0xff]  }
 0x137   :  { %768 = vmatpush1.bf16.msra.mxu1 %v1278_v23  ;;  %v1292_v23 = vld [vmem:[%s1648_s10 + $0x10] sm:$0xff]  }
 0x138   :  { %769 = vmatprep.subr.bf16.mxu1 %v1283_v24  ;;  %v1293_v24 = vld [vmem:[%s1648_s10 + $0x18] sm:$0xff]  }
 0x13b   :  { %770 = vmatpush1.bf16.msra.mxu1 %v1281_v25  ;;  %v1294_v25 = vld [vmem:[%s1648_s10 + $0x20] sm:$0xff]  }
 0x13c   :  { %771 = vmatprep.subr.bf16.mxu1 %v1286_v26  ;;  %v669_v26 = vlaneseq }
 0x13f   :  { %772 = vmatpush1.bf16.msra.mxu1 %v1284_v27  ;;  %v1295_v27 = vld [vmem:[%s1648_s10 + $0x28] sm:$0xff]  }
 0x140   :  { %773 = vmatprep.subr.bf16.mxu1 %v1289_v28  ;;  %v670_v28 = vshrl.u32 %v669_v26, 7 }
 0x143   :  { %774 = vmatpush1.bf16.msra.mxu1 %v1287_v29  ;;  %v671_v29 = vsub.s32 0, %v670_v28 }
 0x1d1   :  { %v348_v32 = vpop.f32.mrb[0].mxu1 }
 0x1d2   :  { %v349_v33 = vadd.f32 %v943_v31, %v348_v32  ;;  %v1145_v34 = vpop.f32.mrb[1].mxu1  ;;  %v1296_v32 = vld [vmem:[%s1648_s10 + $0x30] sm:$0xff]  }
 0x1d3   :  { %v351_v35 = vpop.f32.mrb[2].mxu1  ;;  %v952_v34 = vld [vmem:[%s1650_s7] ss:$0 sm:$0xff] }
 0x1d4   :  { %v352_v36 = vadd.f32 %v943_v31, %v351_v35  ;;  %v1146_v37 = vpop.f32.mrb[3].mxu1  ;;  %v387_v38 = vmax.f32 %v349_v33, 0.0  ;;  %v1297_v33 = vld [vmem:[%s1648_s10 + $0x38] sm:$0xff]  }
 0x1d6   :  { %v388_v39 = vmax.f32 %v352_v36, 0.0 }
 0x1d8   :  { %v397_v40 = vpack.c.bf16 %v388_v39, %v387_v38 }
 0x1d9   :  { %v356_v41 = vpop.f32.mrb[4].mxu1 }
 0x1da   :  { %v357_v42 = vadd.f32 %v943_v31, %v356_v41  ;;  %v1149_v43 = vpop.f32.mrb[5].mxu1  ;;  %1180 = vmatmul.mubr.bf16.vlgmr.msra.gmra.mrb[20].mxu0 %v397_v40 }
 0x1db   :  { %v359_v44 = vpop.f32.mrb[6].mxu1  ;;  %1183 = vmatprep.mubr.msk.bf16.mxu0 %vm1299_vm0, %v1298_v0  ;;  %1214 = vmatpush3.bf16.msra.mxu0 %v1290_v21 }
 0x1dc   :  { %v360_v45 = vadd.f32 %v943_v31, %v359_v44  ;;  %v1150_v46 = vpop.f32.mrb[7].mxu1  ;;  %v389_v47 = vmax.f32 %v357_v42, 0.0  ;;  %1215 = vmatprep.subr.bf16.mxu0 %v1298_v0 }
 0x1de   :  { %v390_v48 = vmax.f32 %v360_v45, 0.0 }
 0x1df   :  { %1216 = vmatpush3.bf16.msra.mxu0 %v1291_v22 }
 0x1e0   :  { %v398_v49 = vpack.c.bf16 %v390_v48, %v389_v47  ;;  %1217 = vmatprep.subr.bf16.mxu0 %v1298_v0 }
 0x1e1   :  { %v364_v50 = vpop.f32.mrb[8].mxu1 }
 0x1e2   :  { %v365_v51 = vadd.f32 %v943_v31, %v364_v50  ;;  %v1153_v52 = vpop.f32.mrb[9].mxu1  ;;  %1184 = vmatmul.mubr.bf16.gmra.mrb[24].mxu0 %v398_v49 }
 0x1e3   :  { %v367_v53 = vpop.f32.mrb[10].mxu1  ;;  %1187 = vmatprep.mubr.msk.bf16.mxu0 %vm1299_vm0, %v1298_v0  ;;  %1218 = vmatpush3.bf16.msra.mxu0 %v1292_v23 }
 0x1e4   :  { %v368_v54 = vadd.f32 %v943_v31, %v367_v53  ;;  %v1154_v55 = vpop.f32.mrb[11].mxu1  ;;  %v391_v56 = vmax.f32 %v365_v51, 0.0  ;;  %1219 = vmatprep.subr.bf16.mxu0 %v1298_v0 }
 0x1e6   :  { %v392_v57 = vmax.f32 %v368_v54, 0.0 }
 0x1e7   :  { %1220 = vmatpush3.bf16.msra.mxu0 %v1293_v24 }
 0x1e8   :  { %v399_v58 = vpack.c.bf16 %v392_v57, %v391_v56  ;;  %1221 = vmatprep.subr.bf16.mxu0 %v1298_v0 }
 0x1e9   :  { %v372_v59 = vpop.f32.mrb[12].mxu1 }
 0x1ea   :  { %v373_v60 = vadd.f32 %v943_v31, %v372_v59  ;;  %v1157_v61 = vpop.f32.mrb[13].mxu1  ;;  %1188 = vmatmul.mubr.bf16.gmra.mrb[28].mxu0 %v399_v58 }
 0x1eb   :  { %v375_v62 = vpop.f32.mrb[14].mxu1  ;;  %1191 = vmatprep.mubr.msk.bf16.mxu0 %vm1299_vm0, %v1298_v0  ;;  %1222 = vmatpush3.bf16.msra.mxu0 %v1294_v25 }
 0x1ec   :  { %v376_v63 = vadd.f32 %v943_v31, %v375_v62  ;;  %v1158_v1 = vpop.f32.mrb[15].mxu1  ;;  %v393_v2 = vmax.f32 %v373_v60, 0.0  ;;  %1223 = vmatprep.subr.bf16.mxu0 %v1298_v0 }
 0x1ee   :  { %v394_v3 = vmax.f32 %v376_v63, 0.0  ;;  %v675_v63 = vsub.s32 1, %v670_v28 }
 0x1ef   :  { %1224 = vmatpush3.bf16.msra.mxu0 %v1295_v27 }
 0x1f0   :  { %v400_v4 = vpack.c.bf16 %v394_v3, %v393_v2  ;;  %1225 = vmatprep.subr.bf16.mxu0 %v1298_v0 }
 0x1f1   :  { %v380_v5 = vpop.f32.mrb[16].mxu1 }
 0x1f2   :  { %v381_v6 = vadd.f32 %v943_v31, %v380_v5  ;;  %v1161_v7 = vpop.f32.mrb[17].mxu1  ;;  %1192 = vmatmul.mubr.bf16.gmra.mrb[32].mxu0 %v400_v4 }
 0x1f3   :  { %v383_v8 = vpop.f32.mrb[18].mxu1  ;;  %1195 = vmatprep.mubr.msk.bf16.mxu0 %vm1299_vm0, %v1298_v0  ;;  %1226 = vmatpush3.bf16.msra.mxu0 %v1296_v32 }
 0x1f4   :  { %v384_v9 = vadd.f32 %v943_v31, %v383_v8  ;;  %v1162_v10 = vpop.f32.mrb[19].mxu1  ;;  %v395_v11 = vmax.f32 %v381_v6, 0.0  ;;  %v672_v31 = vrot.slane %v667_v30, %v671_v29  ;;  %1227 = vmatprep.subr.bf16.mxu0 %v1298_v0  ;;  %v676_v6 = vrot.slane %v667_v30, %v675_v63 }
 0x1f6   :  { %v396_v12 = vmax.f32 %v384_v9, 0.0 }
 0x1f7   :  { %1228 = vmatpush3.bf16.msra.mxu0 %v1297_v33 }
 0x1f8   :  { %v401_v13 = vpack.c.bf16 %v396_v12, %v395_v11 }
 0x1f9   :  { %v641_v14 = vpop.f32.mrb[20].mxu1 }
 0x1fa   :  { %1196 = vmatmul.mubr.bf16.gmra.mrb[36].mxu0 %v401_v13  ;;  %v1211_v15 = vpop.f32.mrb[21].mxu1  ;;  %v648_v17 = vmul.f32 0.2, %v641_v14 }
 0x1fb   :  { %v644_v16 = vpop.f32.mrb[22].mxu1  ;;  %1229 = vmatprep.mubr.msk.bf16.mxu0 %vm1299_vm0, %v1298_v0 }
 0x1fc   :  { %v649_v18 = vmul.f32 0.2, %v644_v16  ;;  %v1212_v19 = vpop.f32.mrb[23].mxu1 }
 0x1fd   :  { %v989_v19 = vld [vmem:[%s1652_s11] ss:$0 sm:$0xff] }
 0x1fe   :  { %v650_v20 = vpack.c.bf16 %v649_v18, %v648_v17 }
 0x200   :  { %792 = vmatmul.mubr.bf16.vlgmr.msra.gmra.mrb[24].mxu1 %v650_v20 }
 0x2ad   :  { %v507_v35 = vpop.f32.mrb[20].mxu0 }
 0x2ae   :  { %v1181_v36 = vpop.f32.mrb[21].mxu0  ;;  %v508_v38 = vadd.f32 %v952_v34, %v507_v35 }
 0x2af   :  { %v510_v37 = vpop.f32.mrb[22].mxu0 }
 0x2b0   :  { %v511_v39 = vadd.f32 %v952_v34, %v510_v37  ;;  %v1182_v40 = vpop.f32.mrb[23].mxu0 }
 0x2b2   :  { %v1011_v41 = vpack.c.bf16 %v511_v39, %v508_v38 }
 0x2b4   :  { %1012 = vst [vmem:[%s1651_s12] sm:$0xff] %v1011_v41  }
 0x2b5   :  { %v515_v0 = vpop.f32.mrb[24].mxu0 }
 0x2b6   :  { %v1185_v42 = vpop.f32.mrb[25].mxu0  ;;  %v516_v44 = vadd.f32 %v952_v34, %v515_v0 }
 0x2b7   :  { %v518_v43 = vpop.f32.mrb[26].mxu0 }
 0x2b8   :  { %v519_v45 = vadd.f32 %v952_v34, %v518_v43  ;;  %v1186_v46 = vpop.f32.mrb[27].mxu0 }
 0x2ba   :  { %v1016_v47 = vpack.c.bf16 %v519_v45, %v516_v44 }
 0x2bc   :  { %1033 = vst [vmem:[%s1651_s12 + $0x8] sm:$0xff] %v1016_v47  }
 0x2bd   :  { %v523_v48 = vpop.f32.mrb[28].mxu0 }
 0x2be   :  { %v1189_v49 = vpop.f32.mrb[29].mxu0  ;;  %v524_v51 = vadd.f32 %v952_v34, %v523_v48 }
 0x2bf   :  { %v526_v50 = vpop.f32.mrb[30].mxu0 }
 0x2c0   :  { %v527_v52 = vadd.f32 %v952_v34, %v526_v50  ;;  %v1190_v53 = vpop.f32.mrb[31].mxu0 }
 0x2c2   :  { %v1021_v54 = vpack.c.bf16 %v527_v52, %v524_v51 }
 0x2c4   :  { %1034 = vst [vmem:[%s1651_s12 + $0x10] sm:$0xff] %v1021_v54  }
 0x2c5   :  { %v531_v55 = vpop.f32.mrb[32].mxu0 }
 0x2c6   :  { %v1193_v56 = vpop.f32.mrb[33].mxu0  ;;  %v532_v58 = vadd.f32 %v952_v34, %v531_v55 }
 0x2c7   :  { %v534_v57 = vpop.f32.mrb[34].mxu0 }
 0x2c8   :  { %v535_v59 = vadd.f32 %v952_v34, %v534_v57  ;;  %v1194_v60 = vpop.f32.mrb[35].mxu0 }
 0x2ca   :  { %v1026_v61 = vpack.c.bf16 %v535_v59, %v532_v58 }
 0x2cc   :  { %1035 = vst [vmem:[%s1651_s12 + $0x18] sm:$0xff] %v1026_v61  }
 0x2cd   :  { %v539_v62 = vpop.f32.mrb[36].mxu0 }
 0x2ce   :  { %v1197_v1 = vpop.f32.mrb[37].mxu0  ;;  %v540_v3 = vadd.f32 %v952_v34, %v539_v62 }
 0x2cf   :  { %v542_v2 = vpop.f32.mrb[38].mxu0 }
 0x2d0   :  { %v543_v4 = vadd.f32 %v952_v34, %v542_v2  ;;  %v1198_v5 = vpop.f32.mrb[39].mxu0 }
 0x2d2   :  { %v1031_v7 = vpack.c.bf16 %v543_v4, %v540_v3 }
 0x2d3   :  { %v793_v8 = vpop.f32.mrb[24].mxu1 }
 0x2d4   :  { %1036 = vst [vmem:[%s1651_s12 + $0x20] sm:$0xff] %v1031_v7   ;;  %v794_v9 = vadd.f32 %v793_v8, %v672_v31  ;;  %v795_v10 = vpop.f32.mrb[25].mxu1 }
 0x2d5   :  { %v796_v11 = vadd.f32 %v795_v10, %v676_v6  ;;  %v797_v12 = vpop.f32.mrb[26].mxu1 }
 0x2d6   :  { %v798_v13 = vadd.f32 %v797_v12, %v672_v31  ;;  %v799_v14 = vpop.f32.mrb[27].mxu1 }
 0x2d7   :  { %v800_v15 = vadd.f32 %v799_v14, %v676_v6  ;;  %v802_v16 = vmax.f32 %v796_v11, 0.0 }
 0x2d9   :  { %v803_v17 = vmax.f32 %v800_v15, 0.0 }
 0x2db   :  { %v804_v18 = vpack.c.bf16 %v803_v17, %v802_v16 }
 0x2dd   :  { %1230 = vmatmul.mubr.bf16.vlgmr.msra.gmra.mrb[40].mxu0 %v804_v18 }
 0x3b0   :  { %v910_v20 = vpop.f32.mrb[40].mxu0 }
 0x3b1   :  { %v911_v21 = vadd.f32 %v989_v19, %v910_v20  ;;  %v1231_v22 = vpop.f32.mrb[41].mxu0 }
 0x3b2   :  { %v913_v23 = vpop.f32.mrb[42].mxu0 }
 0x3b3   :  { %v917_v24 = vadd.f32 %v911_v21, %v794_v9  ;;  %v914_v25 = vadd.f32 %v989_v19, %v913_v23  ;;  %v1232_v26 = vpop.f32.mrb[43].mxu0 }
 0x3b5   :  { %919 = vst [vmem:[%s1653_s13] sm:$0xff] %v917_v24  ;;  %v918_v27 = vadd.f32 %v914_v25, %v798_v13 }
 0x3b7   :  { %920 = vst [vmem:[%s1653_s13 + $0x8] sm:$0xff] %v918_v27 }

</bundles_post_ra>
